<compile_context>
chip_gen: v6e
topology: v6e:2x2x1
jax: 0.10.0
libtpu: 0.0.40
codegen_flags: <defaults>
</compile_context>

<pallas_src>
import numpy as np
import jax
import jax.numpy as jnp
from jax.experimental import pallas as pl
from jax.experimental.pallas import tpu as pltpu

BN_EPS = 1e-5
NUM_CLASS = 10
LANE = 128


def _vmem_spec():
    return pl.BlockSpec(memory_space=pltpu.MemorySpace.VMEM)


# --------------------------- Pallas kernels ---------------------------

def conv_bn_pool_relu_kernel(p_ref, w_ref, o_ref):
    # conv as one MXU matmul on quadrant-ordered im2col patches: (4R, K) @ (K, 128)
    y = jnp.dot(p_ref[...], w_ref[...], preferred_element_type=jnp.float32)
    # BatchNorm2d (training-mode batch stats, affine=False, biased var, one pass)
    mean = jnp.mean(y, axis=0, keepdims=True)
    var = jnp.mean(y * y, axis=0, keepdims=True) - mean * mean
    y = (y - mean) * jax.lax.rsqrt(var + BN_EPS)
    # 2x2 avg pool: rows are ordered (quadrant, b, h2, w2), so pooling is just
    # three adds of contiguous row slabs + scale (VPU work, no matmul).
    r = o_ref.shape[0]
    pooled = 0.25 * (y[0:r] + y[r:2 * r] + y[2 * r:3 * r] + y[3 * r:4 * r])
    o_ref[...] = jnp.maximum(pooled, 0.0)


def conv_mlp_heads_kernel(p_ref, wc_ref, w1_ref, b1_ref, w2_ref, b2_ref,
                          we_ref, be_ref, o_ref):
    batch = o_ref.shape[0]
    # conv2 (matmul on quadrant-ordered im2col patches) + BN2
    y = jnp.dot(p_ref[...], wc_ref[...], preferred_element_type=jnp.float32)   # (64B,128)
    mean = jnp.mean(y, axis=0, keepdims=True)
    var = jnp.mean(y * y, axis=0, keepdims=True) - mean * mean
    y = (y - mean) * jax.lax.rsqrt(var + BN_EPS)
    # 2x2 avg pool + ReLU -> (16*B, 128); rows ordered (spatial position p, b)
    r = 16 * batch
    a = jnp.maximum(0.25 * (y[0:r] + y[r:2 * r] + y[2 * r:3 * r] + y[3 * r:4 * r]), 0.0)
    # flatten + linear1: sum over the 16 spatial positions of per-position matmuls
    # (w1_ref rows are blocked by position; avoids any in-kernel transpose/reshape)
    h = jnp.zeros((batch, LANE), jnp.float32)
    for p in range(16):
        h = h + jnp.dot(a[p * batch:(p + 1) * batch, :],
                        w1_ref[p * LANE:(p + 1) * LANE, :],
                        preferred_element_type=jnp.float32)
    h = jnp.maximum(h + b1_ref[...], 0.0)
    # linear2 + ReLU
    h = jnp.maximum(jnp.dot(h, w2_ref[...], preferred_element_type=jnp.float32)
                    + b2_ref[...], 0.0)
    # all expert heads fused into one matmul (no ReLU on heads)
    o_ref[...] = jnp.dot(h, we_ref[...], preferred_element_type=jnp.float32) + be_ref[...]


def conv_block(patches, w_mat, out_rows):
    return pl.pallas_call(
        conv_bn_pool_relu_kernel,
        out_shape=jax.ShapeDtypeStruct((out_rows, LANE), jnp.float32),
        in_specs=[_vmem_spec()] * 2,
        out_specs=_vmem_spec(),
    )(patches, w_mat)


def conv_mlp_heads(patches2, wc, w1s, b1, w2, b2, we, be, batch):
    return pl.pallas_call(
        conv_mlp_heads_kernel,
        out_shape=jax.ShapeDtypeStruct((batch, LANE), jnp.float32),
        in_specs=[_vmem_spec()] * 8,
        out_specs=_vmem_spec(),
    )(patches2, wc, w1s, b1, w2, b2, we, be)


# --------------------------- JAX glue (layout plumbing only) ---------------------------

def _im2col_nchw(x, K):
    # (B, Cin, H, W) -> (B, OH, OW, Cin*K*K); patch flattened in (c, kh, kw) order
    # to match torch weight.reshape(Cout, Cin*K*K).
    B, Cin, H, W = x.shape
    OH, OW = H - K + 1, W - K + 1
    patches = jnp.stack(
        [jnp.stack([x[:, :, kh:kh + OH, kw:kw + OW] for kw in range(K)], axis=-1)
         for kh in range(K)], axis=-2)             # (B, Cin, OH, OW, K, K)
    patches = patches.transpose(0, 2, 3, 1, 4, 5)  # (B, OH, OW, Cin, K, K)
    return patches.reshape(B, OH, OW, Cin * K * K)


def _quadrant_rows(p_full, pos_major=False):
    # p_full: (B, OH, OW, F), OH/OW even.  Returns (4 * B*PH*PW, F) with the four
    # row-blocks being the 2x2 pooling quadrants.  Rows within a block are ordered
    # (b, h2, w2), or (h2, w2, b) if pos_major=True.
    F = p_full.shape[-1]
    blocks = []
    for dh in (0, 1):
        for dw in (0, 1):
            blk = p_full[:, dh::2, dw::2, :]           # (B, PH, PW, F)
            if pos_major:
                blk = blk.transpose(1, 2, 0, 3)        # (PH, PW, B, F)
            blocks.append(blk.reshape(-1, F))
    return jnp.concatenate(blocks, axis=0)


def _pad2(a, rows, cols):
    return jnp.pad(a, ((0, rows - a.shape[0]), (0, cols - a.shape[1])))


def lenet5_wdn_forward(x, params):
    B = x.shape[0]
    E = len(params["experts_w"])
    assert E * NUM_CLASS <= LANE, "fused expert heads assumed to fit one 128-lane slab"

    # ---- block 1: conv1 -> bn1 -> avgpool2x2 -> relu (one kernel) ----
    p1 = _quadrant_rows(_im2col_nchw(x, 5))                       # (4*B*144, 25)
    w1m = _pad2(params["conv1"].reshape(6, 25).T, 25, LANE)       # (25, 128), 6 real cols
    a1 = conv_block(p1, w1m, B * 144)                             # (B*144, 128), rows (b,h2,w2)

    # ---- block 2 + MLP + expert heads (one fused kernel) ----
    a1_nchw = a1[:, :6].reshape(B, 12, 12, 6).transpose(0, 3, 1, 2)      # (B, 6, 12, 12)
    p2 = _quadrant_rows(_im2col_nchw(a1_nchw, 5), pos_major=True)        # (4*B*16, 150)
    w2m = _pad2(params["conv2"].reshape(16, 150).T, 150, LANE)           # (150, 128)

    # linear1 folded in as 16 per-position weight blocks (torch flatten order c*16+p)
    w1 = params["lin1_w"]                              # (120, 256)
    w1r = w1.reshape(120, 16, 16).transpose(2, 1, 0)   # [p, c, j] = w1[j, c*16 + p]
    w1s = jnp.zeros((16, LANE, LANE), jnp.float32).at[:, :16, :120].set(w1r)
    w1s = w1s.reshape(16 * LANE, LANE)                 # (2048, 128)

    b1 = jnp.zeros((1, LANE), jnp.float32).at[0, :120].set(params["lin1_b"])
    w2l = _pad2(params["lin2_w"].T, LANE, LANE)        # (128, 128), (120x84) real
    b2 = jnp.zeros((1, LANE), jnp.float32).at[0, :84].set(params["lin2_b"])
    we = jnp.concatenate([w.T for w in params["experts_w"]], axis=1)     # (84, E*10)
    wep = _pad2(we, LANE, LANE)
    be = jnp.concatenate(params["experts_b"], axis=0)
    bep = jnp.zeros((1, LANE), jnp.float32).at[0, :E * NUM_CLASS].set(be)

    out = conv_mlp_heads(p2, w2m, w1s, b1, w2l, b2, wep, bep, B)         # (B, 128)
    return [out[:, i * NUM_CLASS:(i + 1) * NUM_CLASS] for i in range(E)]


# --------------------------- params & pure-JAX reference ---------------------------

def init_params(key, num_experts, num_class=NUM_CLASS, in_channel=1):
    ks = jax.random.split(key, 6 + 2 * num_experts)

    def u(k, shape, fan_in):
        bound = 1.0 / np.sqrt(fan_in)
        return jax.random.uniform(k, shape, jnp.float32, -bound, bound)

    return {
        "conv1": u(ks[0], (6, in_channel, 5, 5), in_channel * 25),
        "conv2": u(ks[1], (16, 6, 5, 5), 6 * 25),
        "lin1_w": u(ks[2], (120, 256), 256),
        "lin1_b": u(ks[3], (120,), 256),
        "lin2_w": u(ks[4], (84, 120), 120),
        "lin2_b": u(ks[5], (84,), 120),
        "experts_w": [u(ks[6 + 2 * i], (num_class, 84), 84) for i in range(num_experts)],
        "experts_b": [u(ks[7 + 2 * i], (num_class,), 84) for i in range(num_experts)],
    }


def reference_forward(x, params):
    def conv(y, w):
        return jax.lax.conv_general_dilated(
            y, w, window_strides=(1, 1), padding="VALID",
            dimension_numbers=("NCHW", "OIHW", "NCHW"))

    def bn(y):
        mean = y.mean(axis=(0, 2, 3), keepdims=True)
        var = ((y - mean) ** 2).mean(axis=(0, 2, 3), keepdims=True)
        return (y - mean) * jax.lax.rsqrt(var + BN_EPS)

    def pool(y):
        B, C, H, W = y.shape
        return y.reshape(B, C, H // 2, 2, W // 2, 2).mean(axis=(3, 5))

    out = jax.nn.relu(pool(bn(conv(x, params["conv1"]))))
    out = jax.nn.relu(pool(bn(conv(out, params["conv2"]))))
    flat = out.reshape(x.shape[0], -1)
    h = jax.nn.relu(flat @ params["lin1_w"].T + params["lin1_b"])
    h = jax.nn.relu(h @ params["lin2_w"].T + params["lin2_b"])
    return [h @ w.T + b for w, b in zip(params["experts_w"], params["experts_b"])]


if __name__ == "__main__":
    key = jax.random.PRNGKey(0)
    kx, kp = jax.random.split(key)

    B, E = 2, 3                                   # batch=2, num_experts=3
    x = jax.random.normal(kx, (B, 1, 28, 28), jnp.float32)   # 28x28 forced by 4*4*16 flatten
    params = init_params(kp, num_experts=E)

    outs = lenet5_wdn_forward(x, params)
    outs = [jax.block_until_ready(o) for o in outs]

    refs = reference_forward(x, params)
    for o, r in zip(outs, refs):
        assert o.shape == (B, NUM_CLASS)
        np.testing.assert_allclose(np.asarray(o), np.asarray(r), rtol=2e-4, atol=2e-4)

    print("KERNEL_OK")
</pallas_src>

<mosaic_0001>
module attributes {stable_mosaic.version = 11 : i64} {
  func.func @conv_bn_pool_relu_kernel(%arg0: memref<1152x25xf32, #tpu.memory_space<vmem>>, %arg1: memref<25x128xf32, #tpu.memory_space<vmem>>, %arg2: memref<288x128xf32, #tpu.memory_space<vmem>>) attributes {dimension_semantics = [], scalar_prefetch = 0 : i64, scratch_operands = 0 : i64, tpu.core_type = #tpu.core_type<tc>} {
    %c0 = arith.constant 0 : index
    %c0_0 = arith.constant 0 : index
    %0 = vector.load %arg0[%c0, %c0_0] : memref<1152x25xf32, #tpu.memory_space<vmem>>, vector<1152x25xf32>
    %c0_1 = arith.constant 0 : index
    %c0_2 = arith.constant 0 : index
    %1 = vector.load %arg1[%c0_1, %c0_2] : memref<25x128xf32, #tpu.memory_space<vmem>>, vector<25x128xf32>
    %cst = arith.constant dense<0.000000e+00> : vector<1152x128xf32>
    %2 = tpu.matmul %0, %1, %cst {dimension_numbers = #tpu.dot_dimension_numbers<[1], [0], [0], [1], [0, 0, 1, 1], [], []>} : vector<1152x25xf32>, vector<25x128xf32>, vector<1152x128xf32> -> vector<1152x128xf32>
    %cst_3 = arith.constant dense<0.000000e+00> : vector<128xf32>
    %3 = vector.multi_reduction <add>, %2, %cst_3 [0] : vector<1152x128xf32> to vector<128xf32>
    %4 = vector.shape_cast %3 : vector<128xf32> to vector<1x128xf32>
    %cst_4 = arith.constant 1.152000e+03 : f32
    %5 = vector.broadcast %cst_4 : f32 to vector<1x128xf32>
    %6 = arith.divf %4, %5 : vector<1x128xf32>
    %7 = arith.mulf %2, %2 : vector<1152x128xf32>
    %cst_5 = arith.constant dense<0.000000e+00> : vector<128xf32>
    %8 = vector.multi_reduction <add>, %7, %cst_5 [0] : vector<1152x128xf32> to vector<128xf32>
    %9 = vector.shape_cast %8 : vector<128xf32> to vector<1x128xf32>
    %cst_6 = arith.constant 1.152000e+03 : f32
    %10 = vector.broadcast %cst_6 : f32 to vector<1x128xf32>
    %11 = arith.divf %9, %10 : vector<1x128xf32>
    %12 = arith.mulf %6, %6 : vector<1x128xf32>
    %13 = arith.subf %11, %12 : vector<1x128xf32>
    %14 = vector.broadcast %6 : vector<1x128xf32> to vector<1152x128xf32>
    %15 = arith.subf %2, %14 : vector<1152x128xf32>
    %cst_7 = arith.constant 9.99999974E-6 : f32
    %16 = vector.broadcast %cst_7 : f32 to vector<1x128xf32>
    %17 = arith.addf %13, %16 : vector<1x128xf32>
    %18 = math.rsqrt %17 : vector<1x128xf32>
    %19 = vector.broadcast %18 : vector<1x128xf32> to vector<1152x128xf32>
    %20 = arith.mulf %15, %19 : vector<1152x128xf32>
    %21 = vector.extract_strided_slice %20 {offsets = [0, 0], sizes = [288, 128], strides = [1, 1]} : vector<1152x128xf32> to vector<288x128xf32>
    %22 = vector.extract_strided_slice %20 {offsets = [288, 0], sizes = [288, 128], strides = [1, 1]} : vector<1152x128xf32> to vector<288x128xf32>
    %23 = arith.addf %21, %22 : vector<288x128xf32>
    %24 = vector.extract_strided_slice %20 {offsets = [576, 0], sizes = [288, 128], strides = [1, 1]} : vector<1152x128xf32> to vector<288x128xf32>
    %25 = arith.addf %23, %24 : vector<288x128xf32>
    %26 = vector.extract_strided_slice %20 {offsets = [864, 0], sizes = [288, 128], strides = [1, 1]} : vector<1152x128xf32> to vector<288x128xf32>
    %27 = arith.addf %25, %26 : vector<288x128xf32>
    %cst_8 = arith.constant 2.500000e-01 : f32
    %28 = vector.broadcast %cst_8 : f32 to vector<288x128xf32>
    %29 = arith.mulf %28, %27 : vector<288x128xf32>
    %cst_9 = arith.constant 0.000000e+00 : f32
    %30 = vector.broadcast %cst_9 : f32 to vector<288x128xf32>
    %31 = arith.maximumf %29, %30 : vector<288x128xf32>
    %c0_10 = arith.constant 0 : index
    %c0_11 = arith.constant 0 : index
    %32 = vector.load %arg2[%c0_10, %c0_11] : memref<288x128xf32, #tpu.memory_space<vmem>>, vector<288x128xf32>
    tpu.vector_store %arg2[%c0_10, %c0_11], %31 {strides = array<i32>} : memref<288x128xf32, #tpu.memory_space<vmem>>, vector<288x128xf32>,
    return
  }
}

</mosaic_0001>

<bundles_post_ra>
// kernel: tpu_custom_call.1
= control target key start
LH: loop header
LB: loop body
LE: loop exit
PB: predicated region body
PF: predicated region fallthrough
CT: control target
= control target key end

     0   :  { %vm593_vm0 = vcmask 1040384   ;;  %vm160_vm1 = vcmask 203776   ;;  %s5585_s0 = inlined_call_operand.vmem [shape: f32[1152,25], index: 0, kind: input, shape index: {}]   ;;  %s5586_s1 = inlined_call_operand.vmem [shape: f32[25,128], index: 1, kind: input, shape index: {}]   ;;  %s5587_s2 = inlined_call_operand.hbm [shape: f32[288,128], index: 2, kind: output, shape index: {}]  }
   0x1   :  { %v159_v0 = vld [vmem:[%s5586_s1 + $0x18] sm:$0x1]  ;;  %v158_v1 = vld [vmem:[%s5586_s1 + $0x10] sm:$0xff]  ;;  %v12_v2 = vld [vmem:[%s5585_s0] sm:$0xff] }
   0x2   :  { %2644 = vmatprep.subr.msk.mxu0 %vm593_vm0, %v159_v0  ;;  %2868 = vmatprep.subr.msk.mxu1 %vm593_vm0, %v159_v0  ;;  %v157_v3 = vld [vmem:[%s5586_s1 + $0x8] sm:$0xff]  ;;  %v156_v4 = vld [vmem:[%s5586_s1] sm:$0xff]  ;;  %v14_v6 = vld [vmem:[%s5585_s0 + $0x10] sm:$0xff] }
   0x3   :  { %2645 = vmatpush3.msk.msra.mxu0 %vm593_vm0, %v159_v0  ;;  %2652 = vmatprep.mubr.msk.f32.mxu0 %vm160_vm1, %v12_v2  ;;  %v13_v5 = vld [vmem:[%s5585_s0 + $0x8] sm:$0xff]  ;;  %v15_v7 = vld [vmem:[%s5585_s0 + $0x18] sm:$0xff]  ;;  %v16_v8 = vld [vmem:[%s5585_s0 + $0x20] sm:$0xff] }
   0x4   :  { %2646 = vmatprep.subr.mxu0 %v158_v1  ;;  %2872 = vmatpush3.msk.msra.mxu1 %vm593_vm0, %v159_v0  ;;  %v17_v9 = vld [vmem:[%s5585_s0 + $0x28] sm:$0xff]  ;;  %v18_v10 = vld [vmem:[%s5585_s0 + $0x30] sm:$0xff]  ;;  %v19_v11 = vld [vmem:[%s5585_s0 + $0x38] sm:$0xff] }
   0x5   :  { %2647 = vmatpush3.msra.mxu0 %v158_v1  ;;  %2869 = vmatprep.subr.mxu1 %v158_v1  ;;  %v20_v12 = vld [vmem:[%s5585_s0 + $0x40] sm:$0xff]  ;;  %v21_v13 = vld [vmem:[%s5585_s0 + $0x48] sm:$0xff]  ;;  %v22_v14 = vld [vmem:[%s5585_s0 + $0x50] sm:$0xff] }
   0x6   :  { %2648 = vmatprep.subr.mxu0 %v157_v3  ;;  %2873 = vmatpush3.msra.mxu1 %v158_v1  ;;  %v84_v15 = vld [vmem:[%s5585_s0 + $0x240] sm:$0xff]  ;;  %v85_v16 = vld [vmem:[%s5585_s0 + $0x248] sm:$0xff]  ;;  %v23_v17 = vld [vmem:[%s5585_s0 + $0x58] sm:$0xff] }
   0x7   :  { %2649 = vmatpush3.msra.mxu0 %v157_v3  ;;  %2870 = vmatprep.subr.mxu1 %v157_v3  ;;  %v86_v18 = vld [vmem:[%s5585_s0 + $0x250] sm:$0xff]  ;;  %v24_v19 = vld [vmem:[%s5585_s0 + $0x60] sm:$0xff]  ;;  %v87_v20 = vld [vmem:[%s5585_s0 + $0x258] sm:$0xff] }
   0x8   :  { %2650 = vmatprep.subr.mxu0 %v156_v4  ;;  %2874 = vmatpush3.msra.mxu1 %v157_v3  ;;  %v88_v21 = vld [vmem:[%s5585_s0 + $0x260] sm:$0xff]  ;;  %v25_v22 = vld [vmem:[%s5585_s0 + $0x68] sm:$0xff]  ;;  %v26_v23 = vld [vmem:[%s5585_s0 + $0x70] sm:$0xff] }
   0x9   :  { %2651 = vmatpush3.msra.mxu0 %v156_v4  ;;  %2871 = vmatprep.subr.mxu1 %v156_v4  ;;  %v89_v24 = vld [vmem:[%s5585_s0 + $0x268] sm:$0xff]  ;;  %v90_v25 = vld [vmem:[%s5585_s0 + $0x270] sm:$0xff]  ;;  %v27_v26 = vld [vmem:[%s5585_s0 + $0x78] sm:$0xff] }
   0xa   :  { %2653 = vmatmul.mubr.msk.f32.vlgmr.msra.gmra.mxu0 %vm160_vm1, %v13_v5  ;;  %2875 = vmatpush3.msra.mxu1 %v156_v4 }
   0xb   :  { %2655 = vmatprep.mubr.msk.f32.mxu0 %vm160_vm1, %v14_v6  ;;  %2760 = vmatprep.mubr.msk.f32.mxu1 %vm160_vm1, %v84_v15 }
   0xc   :  { %2761 = vmatmul.mubr.msk.f32.vlgmr.msra.gmra.mxu1 %vm160_vm1, %v85_v16 }
   0xd   :  { %2763 = vmatprep.mubr.msk.f32.mxu1 %vm160_vm1, %v86_v18 }
   0xe   :  { %2656 = vmatmul.mubr.msk.f32.gmra.mxu0 %vm160_vm1, %v15_v7 }
   0xf   :  { %2658 = vmatprep.mubr.msk.f32.mxu0 %vm160_vm1, %v16_v8 }
  0x10   :  { %2764 = vmatmul.mubr.msk.f32.gmra.mxu1 %vm160_vm1, %v87_v20 }
  0x11   :  { %2766 = vmatprep.mubr.msk.f32.mxu1 %vm160_vm1, %v88_v21 }
  0x12   :  { %2659 = vmatmul.mubr.msk.f32.gmra.mxu0 %vm160_vm1, %v17_v9 }
  0x13   :  { %2661 = vmatprep.mubr.msk.f32.mxu0 %vm160_vm1, %v18_v10 }
  0x16   :  { %2662 = vmatmul.mubr.msk.f32.gmra.mxu0 %vm160_vm1, %v19_v11 }
  0x17   :  { %2664 = vmatprep.mubr.msk.f32.mxu0 %vm160_vm1, %v20_v12 }
  0x1a   :  { %2665 = vmatmul.mubr.msk.f32.gmra.mxu0 %vm160_vm1, %v21_v13 }
  0x1b   :  { %2667 = vmatprep.mubr.msk.f32.mxu0 %vm160_vm1, %v22_v14 }
  0x1e   :  { %2668 = vmatmul.mubr.msk.f32.gmra.mxu0 %vm160_vm1, %v23_v17 }
  0x1f   :  { %2670 = vmatprep.mubr.msk.f32.mxu0 %vm160_vm1, %v24_v19 }
  0x22   :  { %2671 = vmatmul.mubr.msk.f32.gmra.mxu0 %vm160_vm1, %v25_v22 }
  0x23   :  { %2673 = vmatprep.mubr.msk.f32.mxu0 %vm160_vm1, %v26_v23 }
  0x24   :  { %7 = vsyncpa [#allocation3], 0  ;;  %v28_v27 = vld [vmem:[%s5585_s0 + $0x80] sm:$0xff]  ;;  %2767 = vmatmul.mubr.msk.f32.gmra.mxu1 %vm160_vm1, %v89_v24  ;;  %v91_v28 = vld [vmem:[%s5585_s0 + $0x278] sm:$0xff] }
  0x25   :  { %2769 = vmatprep.mubr.msk.f32.mxu1 %vm160_vm1, %v90_v25  ;;  %v92_v29 = vld [vmem:[%s5585_s0 + $0x280] sm:$0xff]  ;;  %v29_v30 = vld [vmem:[%s5585_s0 + $0x88] sm:$0xff]  ;;  %v30_v31 = vld [vmem:[%s5585_s0 + $0x90] sm:$0xff] }
  0x26   :  { %2674 = vmatmul.mubr.msk.f32.gmra.mxu0 %vm160_vm1, %v27_v26  ;;  %v93_v32 = vld [vmem:[%s5585_s0 + $0x288] sm:$0xff]  ;;  %v94_v33 = vld [vmem:[%s5585_s0 + $0x290] sm:$0xff]  ;;  %v31_v34 = vld [vmem:[%s5585_s0 + $0x98] sm:$0xff] }
  0x27   :  { %2676 = vmatprep.mubr.msk.f32.mxu0 %vm160_vm1, %v28_v27  ;;  %v32_v35 = vld [vmem:[%s5585_s0 + $0xa0] sm:$0xff]  ;;  %v95_v36 = vld [vmem:[%s5585_s0 + $0x298] sm:$0xff]  ;;  %v33_v38 = vld [vmem:[%s5585_s0 + $0xa8] sm:$0xff] }
  0x28   :  { %2770 = vmatmul.mubr.msk.f32.gmra.mxu1 %vm160_vm1, %v91_v28  ;;  %v96_v37 = vld [vmem:[%s5585_s0 + $0x2a0] sm:$0xff]  ;;  %v34_v39 = vld [vmem:[%s5585_s0 + $0xb0] sm:$0xff]  ;;  %v97_v40 = vld [vmem:[%s5585_s0 + $0x2a8] sm:$0xff] }
  0x29   :  { %2772 = vmatprep.mubr.msk.f32.mxu1 %vm160_vm1, %v92_v29  ;;  %v98_v41 = vld [vmem:[%s5585_s0 + $0x2b0] sm:$0xff]  ;;  %v35_v42 = vld [vmem:[%s5585_s0 + $0xb8] sm:$0xff]  ;;  %v36_v43 = vld [vmem:[%s5585_s0 + $0xc0] sm:$0xff] }
  0x2a   :  { %2677 = vmatmul.mubr.msk.f32.gmra.mxu0 %vm160_vm1, %v29_v30  ;;  %v99_v44 = vld [vmem:[%s5585_s0 + $0x2b8] sm:$0xff]  ;;  %v100_v45 = vld [vmem:[%s5585_s0 + $0x2c0] sm:$0xff]  ;;  %v37_v46 = vld [vmem:[%s5585_s0 + $0xc8] sm:$0xff] }
  0x2b   :  { %2679 = vmatprep.mubr.msk.f32.mxu0 %vm160_vm1, %v30_v31  ;;  %v38_v47 = vld [vmem:[%s5585_s0 + $0xd0] sm:$0xff]  ;;  %v101_v48 = vld [vmem:[%s5585_s0 + $0x2c8] sm:$0xff]  ;;  %v39_v50 = vld [vmem:[%s5585_s0 + $0xd8] sm:$0xff] }
  0x2c   :  { %2773 = vmatmul.mubr.msk.f32.gmra.mxu1 %vm160_vm1, %v93_v32  ;;  %v102_v49 = vld [vmem:[%s5585_s0 + $0x2d0] sm:$0xff]  ;;  %v40_v51 = vld [vmem:[%s5585_s0 + $0xe0] sm:$0xff]  ;;  %v103_v52 = vld [vmem:[%s5585_s0 + $0x2d8] sm:$0xff] }
  0x2d   :  { %2775 = vmatprep.mubr.msk.f32.mxu1 %vm160_vm1, %v94_v33  ;;  %v104_v53 = vld [vmem:[%s5585_s0 + $0x2e0] sm:$0xff]  ;;  %v41_v54 = vld [vmem:[%s5585_s0 + $0xe8] sm:$0xff]  ;;  %v42_v55 = vld [vmem:[%s5585_s0 + $0xf0] sm:$0xff] }
  0x2e   :  { %2680 = vmatmul.mubr.msk.f32.gmra.mxu0 %vm160_vm1, %v31_v34  ;;  %v105_v56 = vld [vmem:[%s5585_s0 + $0x2e8] sm:$0xff]  ;;  %v106_v57 = vld [vmem:[%s5585_s0 + $0x2f0] sm:$0xff]  ;;  %v43_v58 = vld [vmem:[%s5585_s0 + $0xf8] sm:$0xff] }
  0x2f   :  { %2682 = vmatprep.mubr.msk.f32.mxu0 %vm160_vm1, %v32_v35  ;;  %v44_v59 = vld [vmem:[%s5585_s0 + $0x100] sm:$0xff]  ;;  %v107_v60 = vld [vmem:[%s5585_s0 + $0x2f8] sm:$0xff]  ;;  %v45_v62 = vld [vmem:[%s5585_s0 + $0x108] sm:$0xff] }
  0x30   :  { %2776 = vmatmul.mubr.msk.f32.gmra.mxu1 %vm160_vm1, %v95_v36  ;;  %v108_v61 = vld [vmem:[%s5585_s0 + $0x300] sm:$0xff]  ;;  %v46_v63 = vld [vmem:[%s5585_s0 + $0x110] sm:$0xff]  ;;  %v109_v0 = vld [vmem:[%s5585_s0 + $0x308] sm:$0xff] }
  0x31   :  { %2778 = vmatprep.mubr.msk.f32.mxu1 %vm160_vm1, %v96_v37  ;;  %v110_v1 = vld [vmem:[%s5585_s0 + $0x310] sm:$0xff]  ;;  %v47_v2 = vld [vmem:[%s5585_s0 + $0x118] sm:$0xff]  ;;  %v48_v3 = vld [vmem:[%s5585_s0 + $0x120] sm:$0xff] }
  0x32   :  { %2683 = vmatmul.mubr.msk.f32.gmra.mxu0 %vm160_vm1, %v33_v38  ;;  %v111_v4 = vld [vmem:[%s5585_s0 + $0x318] sm:$0xff]  ;;  %v112_v5 = vld [vmem:[%s5585_s0 + $0x320] sm:$0xff]  ;;  %v49_v6 = vld [vmem:[%s5585_s0 + $0x128] sm:$0xff] }
  0x33   :  { %2685 = vmatprep.mubr.msk.f32.mxu0 %vm160_vm1, %v34_v39  ;;  %v50_v7 = vld [vmem:[%s5585_s0 + $0x130] sm:$0xff]  ;;  %v113_v8 = vld [vmem:[%s5585_s0 + $0x328] sm:$0xff]  ;;  %v51_v10 = vld [vmem:[%s5585_s0 + $0x138] sm:$0xff] }
  0x34   :  { %2779 = vmatmul.mubr.msk.f32.gmra.mxu1 %vm160_vm1, %v97_v40  ;;  %v114_v9 = vld [vmem:[%s5585_s0 + $0x330] sm:$0xff]  ;;  %v52_v11 = vld [vmem:[%s5585_s0 + $0x140] sm:$0xff]  ;;  %v115_v12 = vld [vmem:[%s5585_s0 + $0x338] sm:$0xff] }
  0x35   :  { %2781 = vmatprep.mubr.msk.f32.mxu1 %vm160_vm1, %v98_v41  ;;  %v116_v13 = vld [vmem:[%s5585_s0 + $0x340] sm:$0xff]  ;;  %v53_v14 = vld [vmem:[%s5585_s0 + $0x148] sm:$0xff]  ;;  %v54_v15 = vld [vmem:[%s5585_s0 + $0x150] sm:$0xff] }
  0x36   :  { %2686 = vmatmul.mubr.msk.f32.gmra.mxu0 %vm160_vm1, %v35_v42  ;;  %v117_v16 = vld [vmem:[%s5585_s0 + $0x348] sm:$0xff]  ;;  %v118_v17 = vld [vmem:[%s5585_s0 + $0x350] sm:$0xff]  ;;  %v55_v18 = vld [vmem:[%s5585_s0 + $0x158] sm:$0xff] }
  0x37   :  { %2688 = vmatprep.mubr.msk.f32.mxu0 %vm160_vm1, %v36_v43  ;;  %v56_v19 = vld [vmem:[%s5585_s0 + $0x160] sm:$0xff]  ;;  %v119_v20 = vld [vmem:[%s5585_s0 + $0x358] sm:$0xff]  ;;  %v57_v22 = vld [vmem:[%s5585_s0 + $0x168] sm:$0xff] }
  0x38   :  { %2782 = vmatmul.mubr.msk.f32.gmra.mxu1 %vm160_vm1, %v99_v44  ;;  %v120_v21 = vld [vmem:[%s5585_s0 + $0x360] sm:$0xff]  ;;  %v58_v23 = vld [vmem:[%s5585_s0 + $0x170] sm:$0xff]  ;;  %v121_v24 = vld [vmem:[%s5585_s0 + $0x368] sm:$0xff] }
  0x39   :  { %2784 = vmatprep.mubr.msk.f32.mxu1 %vm160_vm1, %v100_v45  ;;  %v122_v25 = vld [vmem:[%s5585_s0 + $0x370] sm:$0xff]  ;;  %v59_v26 = vld [vmem:[%s5585_s0 + $0x178] sm:$0xff]  ;;  %v60_v27 = vld [vmem:[%s5585_s0 + $0x180] sm:$0xff] }
  0x3a   :  { %2689 = vmatmul.mubr.msk.f32.gmra.mxu0 %vm160_vm1, %v37_v46  ;;  %v123_v28 = vld [vmem:[%s5585_s0 + $0x378] sm:$0xff]  ;;  %v124_v29 = vld [vmem:[%s5585_s0 + $0x380] sm:$0xff]  ;;  %v61_v30 = vld [vmem:[%s5585_s0 + $0x188] sm:$0xff] }
  0x3b   :  { %2691 = vmatprep.mubr.msk.f32.mxu0 %vm160_vm1, %v38_v47  ;;  %v62_v31 = vld [vmem:[%s5585_s0 + $0x190] sm:$0xff]  ;;  %v125_v32 = vld [vmem:[%s5585_s0 + $0x388] sm:$0xff]  ;;  %v63_v34 = vld [vmem:[%s5585_s0 + $0x198] sm:$0xff] }
  0x3c   :  { %2785 = vmatmul.mubr.msk.f32.gmra.mxu1 %vm160_vm1, %v101_v48  ;;  %v126_v33 = vld [vmem:[%s5585_s0 + $0x390] sm:$0xff]  ;;  %v64_v35 = vld [vmem:[%s5585_s0 + $0x1a0] sm:$0xff]  ;;  %v127_v36 = vld [vmem:[%s5585_s0 + $0x398] sm:$0xff] }
  0x3d   :  { %2787 = vmatprep.mubr.msk.f32.mxu1 %vm160_vm1, %v102_v49  ;;  %v128_v37 = vld [vmem:[%s5585_s0 + $0x3a0] sm:$0xff]  ;;  %v65_v38 = vld [vmem:[%s5585_s0 + $0x1a8] sm:$0xff]  ;;  %v66_v39 = vld [vmem:[%s5585_s0 + $0x1b0] sm:$0xff] }
  0x3e   :  { %2692 = vmatmul.mubr.msk.f32.gmra.mxu0 %vm160_vm1, %v39_v50  ;;  %v129_v40 = vld [vmem:[%s5585_s0 + $0x3a8] sm:$0xff]  ;;  %v130_v41 = vld [vmem:[%s5585_s0 + $0x3b0] sm:$0xff]  ;;  %v67_v42 = vld [vmem:[%s5585_s0 + $0x1b8] sm:$0xff] }
  0x3f   :  { %2694 = vmatprep.mubr.msk.f32.mxu0 %vm160_vm1, %v40_v51  ;;  %v68_v43 = vld [vmem:[%s5585_s0 + $0x1c0] sm:$0xff]  ;;  %v131_v44 = vld [vmem:[%s5585_s0 + $0x3b8] sm:$0xff]  ;;  %v69_v46 = vld [vmem:[%s5585_s0 + $0x1c8] sm:$0xff] }
  0x40   :  { %2788 = vmatmul.mubr.msk.f32.gmra.mxu1 %vm160_vm1, %v103_v52  ;;  %v132_v45 = vld [vmem:[%s5585_s0 + $0x3c0] sm:$0xff]  ;;  %v70_v47 = vld [vmem:[%s5585_s0 + $0x1d0] sm:$0xff]  ;;  %v133_v48 = vld [vmem:[%s5585_s0 + $0x3c8] sm:$0xff] }
  0x41   :  { %2790 = vmatprep.mubr.msk.f32.mxu1 %vm160_vm1, %v104_v53  ;;  %v134_v49 = vld [vmem:[%s5585_s0 + $0x3d0] sm:$0xff]  ;;  %v71_v50 = vld [vmem:[%s5585_s0 + $0x1d8] sm:$0xff]  ;;  %v72_v51 = vld [vmem:[%s5585_s0 + $0x1e0] sm:$0xff] }
  0x42   :  { %2695 = vmatmul.mubr.msk.f32.gmra.mxu0 %vm160_vm1, %v41_v54  ;;  %v135_v52 = vld [vmem:[%s5585_s0 + $0x3d8] sm:$0xff]  ;;  %v136_v53 = vld [vmem:[%s5585_s0 + $0x3e0] sm:$0xff]  ;;  %v73_v54 = vld [vmem:[%s5585_s0 + $0x1e8] sm:$0xff] }
  0x43   :  { %2697 = vmatprep.mubr.msk.f32.mxu0 %vm160_vm1, %v42_v55  ;;  %v74_v55 = vld [vmem:[%s5585_s0 + $0x1f0] sm:$0xff] }
  0x44   :  { %2791 = vmatmul.mubr.msk.f32.gmra.mxu1 %vm160_vm1, %v105_v56  ;;  %v137_v56 = vld [vmem:[%s5585_s0 + $0x3e8] sm:$0xff] }
  0x45   :  { %2793 = vmatprep.mubr.msk.f32.mxu1 %vm160_vm1, %v106_v57  ;;  %v138_v57 = vld [vmem:[%s5585_s0 + $0x3f0] sm:$0xff] }
  0x46   :  { %2698 = vmatmul.mubr.msk.f32.gmra.mxu0 %vm160_vm1, %v43_v58  ;;  %v75_v58 = vld [vmem:[%s5585_s0 + $0x1f8] sm:$0xff] }
  0x47   :  { %2700 = vmatprep.mubr.msk.f32.mxu0 %vm160_vm1, %v44_v59  ;;  %v76_v59 = vld [vmem:[%s5585_s0 + $0x200] sm:$0xff] }
  0x48   :  { %2794 = vmatmul.mubr.msk.f32.gmra.mxu1 %vm160_vm1, %v107_v60  ;;  %v139_v60 = vld [vmem:[%s5585_s0 + $0x3f8] sm:$0xff] }
  0x49   :  { %2796 = vmatprep.mubr.msk.f32.mxu1 %vm160_vm1, %v108_v61  ;;  %v140_v61 = vld [vmem:[%s5585_s0 + $0x400] sm:$0xff] }
  0x4a   :  { %2701 = vmatmul.mubr.msk.f32.gmra.mxu0 %vm160_vm1, %v45_v62  ;;  %v77_v62 = vld [vmem:[%s5585_s0 + $0x208] sm:$0xff] }
  0x4b   :  { %2703 = vmatprep.mubr.msk.f32.mxu0 %vm160_vm1, %v46_v63  ;;  %v78_v63 = vld [vmem:[%s5585_s0 + $0x210] sm:$0xff] }
  0x4c   :  { %2797 = vmatmul.mubr.msk.f32.gmra.mxu1 %vm160_vm1, %v109_v0  ;;  %v141_v0 = vld [vmem:[%s5585_s0 + $0x408] sm:$0xff] }
  0x4d   :  { %2799 = vmatprep.mubr.msk.f32.mxu1 %vm160_vm1, %v110_v1  ;;  %v142_v1 = vld [vmem:[%s5585_s0 + $0x410] sm:$0xff] }
  0x4e   :  { %2704 = vmatmul.mubr.msk.f32.gmra.mxu0 %vm160_vm1, %v47_v2  ;;  %v79_v2 = vld [vmem:[%s5585_s0 + $0x218] sm:$0xff] }
  0x4f   :  { %2706 = vmatprep.mubr.msk.f32.mxu0 %vm160_vm1, %v48_v3  ;;  %v80_v3 = vld [vmem:[%s5585_s0 + $0x220] sm:$0xff] }
  0x50   :  { %2800 = vmatmul.mubr.msk.f32.gmra.mxu1 %vm160_vm1, %v111_v4  ;;  %v143_v4 = vld [vmem:[%s5585_s0 + $0x418] sm:$0xff] }
  0x51   :  { %2802 = vmatprep.mubr.msk.f32.mxu1 %vm160_vm1, %v112_v5  ;;  %v144_v5 = vld [vmem:[%s5585_s0 + $0x420] sm:$0xff] }
  0x52   :  { %2707 = vmatmul.mubr.msk.f32.gmra.mxu0 %vm160_vm1, %v49_v6  ;;  %v81_v6 = vld [vmem:[%s5585_s0 + $0x228] sm:$0xff] }
  0x53   :  { %2709 = vmatprep.mubr.msk.f32.mxu0 %vm160_vm1, %v50_v7  ;;  %v82_v7 = vld [vmem:[%s5585_s0 + $0x230] sm:$0xff] }
  0x54   :  { %2803 = vmatmul.mubr.msk.f32.gmra.mxu1 %vm160_vm1, %v113_v8  ;;  %v145_v8 = vld [vmem:[%s5585_s0 + $0x428] sm:$0xff] }
  0x55   :  { %2805 = vmatprep.mubr.msk.f32.mxu1 %vm160_vm1, %v114_v9  ;;  %v146_v9 = vld [vmem:[%s5585_s0 + $0x430] sm:$0xff] }
  0x56   :  { %2710 = vmatmul.mubr.msk.f32.gmra.mxu0 %vm160_vm1, %v51_v10  ;;  %v83_v10 = vld [vmem:[%s5585_s0 + $0x238] sm:$0xff] }
  0x57   :  { %2712 = vmatprep.mubr.msk.f32.mxu0 %vm160_vm1, %v52_v11  ;;  %v147_v11 = vld [vmem:[%s5585_s0 + $0x438] sm:$0xff] }
  0x58   :  { %2806 = vmatmul.mubr.msk.f32.gmra.mxu1 %vm160_vm1, %v115_v12  ;;  %v148_v12 = vld [vmem:[%s5585_s0 + $0x440] sm:$0xff] }
  0x59   :  { %2808 = vmatprep.mubr.msk.f32.mxu1 %vm160_vm1, %v116_v13  ;;  %v149_v13 = vld [vmem:[%s5585_s0 + $0x448] sm:$0xff] }
  0x5a   :  { %2713 = vmatmul.mubr.msk.f32.gmra.mxu0 %vm160_vm1, %v53_v14  ;;  %v150_v14 = vld [vmem:[%s5585_s0 + $0x450] sm:$0xff] }
  0x5b   :  { %2715 = vmatprep.mubr.msk.f32.mxu0 %vm160_vm1, %v54_v15  ;;  %v151_v15 = vld [vmem:[%s5585_s0 + $0x458] sm:$0xff] }
  0x5c   :  { %2809 = vmatmul.mubr.msk.f32.gmra.mxu1 %vm160_vm1, %v117_v16  ;;  %v152_v16 = vld [vmem:[%s5585_s0 + $0x460] sm:$0xff] }
  0x5d   :  { %2811 = vmatprep.mubr.msk.f32.mxu1 %vm160_vm1, %v118_v17  ;;  %v153_v17 = vld [vmem:[%s5585_s0 + $0x468] sm:$0xff] }
  0x5e   :  { %2716 = vmatmul.mubr.msk.f32.gmra.mxu0 %vm160_vm1, %v55_v18  ;;  %v154_v18 = vld [vmem:[%s5585_s0 + $0x470] sm:$0xff] }
  0x5f   :  { %2718 = vmatprep.mubr.msk.f32.mxu0 %vm160_vm1, %v56_v19  ;;  %v155_v19 = vld [vmem:[%s5585_s0 + $0x478] sm:$0xff]  ;;  %s2903_s0 = smov [#allocation2]  }
  0x60   :  { %2812 = vmatmul.mubr.msk.f32.gmra.mxu1 %vm160_vm1, %v119_v20  ;;  %s2340_s15 = sshll.u32 %s2903_s0, 4  ;;  %s2341_s15 = int_to_ptr.vmem [resolvable:$true] %s2340_s15 }
  0x61   :  { %2814 = vmatprep.mubr.msk.f32.mxu1 %vm160_vm1, %v120_v21  ;;  %s2881_s16 = scalar_lea.vmem %s2341_s15, 4608  ;;  %p2886_p1 = scmp.lt.s32.totalorder %s2341_s15, %s2341_s15 }
  0x62   :  { %2719 = vmatmul.mubr.msk.f32.gmra.mxu0 %vm160_vm1, %v57_v22  ;;  %p2882_p0 = scmp.ne.s32.totalorder %s2341_s15, %s2881_s16  ;;  %p2887_p2 = scmp.lt.s32.totalorder %s2881_s16, %s2881_s16 }
  0x63   :  { %2721 = vmatprep.mubr.msk.f32.mxu0 %vm160_vm1, %v58_v23 }
  0x64   :  { %2815 = vmatmul.mubr.msk.f32.gmra.mxu1 %vm160_vm1, %v121_v24  ;;  %p2888_p3 = por %p2887_p2, %p2886_p1 }
  0x65   :  { %2817 = vmatprep.mubr.msk.f32.mxu1 %vm160_vm1, %v122_v25 }
  0x66   :  { %2722 = vmatmul.mubr.msk.f32.gmra.mxu0 %vm160_vm1, %v59_v26  ;;  %p2889_p4 = pnand %p2888_p3, %p2882_p0 }
  0x67   :  { %2724 = vmatprep.mubr.msk.f32.mxu0 %vm160_vm1, %v60_v27 }
  0x68   :  { %2818 = vmatmul.mubr.msk.f32.gmra.mxu1 %vm160_vm1, %v123_v28 }
  0x69   :  { %2820 = vmatprep.mubr.msk.f32.mxu1 %vm160_vm1, %v124_v29 }
  0x6a   :  { %2725 = vmatmul.mubr.msk.f32.gmra.mxu0 %vm160_vm1, %v61_v30 }
  0x6b   :  { %2727 = vmatprep.mubr.msk.f32.mxu0 %vm160_vm1, %v62_v31 }
  0x6c   :  { %2821 = vmatmul.mubr.msk.f32.gmra.mxu1 %vm160_vm1, %v125_v32 }
  0x6d   :  { %2823 = vmatprep.mubr.msk.f32.mxu1 %vm160_vm1, %v126_v33 }
  0x6e   :  { %2728 = vmatmul.mubr.msk.f32.gmra.mxu0 %vm160_vm1, %v63_v34 }
  0x6f   :  { %2730 = vmatprep.mubr.msk.f32.mxu0 %vm160_vm1, %v64_v35 }
  0x70   :  { %2824 = vmatmul.mubr.msk.f32.gmra.mxu1 %vm160_vm1, %v127_v36 }
  0x71   :  { %2826 = vmatprep.mubr.msk.f32.mxu1 %vm160_vm1, %v128_v37 }
  0x72   :  { %2731 = vmatmul.mubr.msk.f32.gmra.mxu0 %vm160_vm1, %v65_v38 }
  0x73   :  { %2733 = vmatprep.mubr.msk.f32.mxu0 %vm160_vm1, %v66_v39 }
  0x74   :  { %2827 = vmatmul.mubr.msk.f32.gmra.mxu1 %vm160_vm1, %v129_v40 }
  0x75   :  { %2829 = vmatprep.mubr.msk.f32.mxu1 %vm160_vm1, %v130_v41 }
  0x76   :  { %2734 = vmatmul.mubr.msk.f32.gmra.mxu0 %vm160_vm1, %v67_v42 }
  0x77   :  { %2736 = vmatprep.mubr.msk.f32.mxu0 %vm160_vm1, %v68_v43 }
  0x78   :  { %2830 = vmatmul.mubr.msk.f32.gmra.mxu1 %vm160_vm1, %v131_v44 }
  0x79   :  { %2832 = vmatprep.mubr.msk.f32.mxu1 %vm160_vm1, %v132_v45 }
  0x7a   :  { %2737 = vmatmul.mubr.msk.f32.gmra.mxu0 %vm160_vm1, %v69_v46 }
  0x7b   :  { %2739 = vmatprep.mubr.msk.f32.mxu0 %vm160_vm1, %v70_v47 }
  0x7c   :  { %2833 = vmatmul.mubr.msk.f32.gmra.mxu1 %vm160_vm1, %v133_v48 }
  0x7d   :  { %2835 = vmatprep.mubr.msk.f32.mxu1 %vm160_vm1, %v134_v49 }
  0x7e   :  { %2740 = vmatmul.mubr.msk.f32.gmra.mxu0 %vm160_vm1, %v71_v50 }
  0x7f   :  { %2742 = vmatprep.mubr.msk.f32.mxu0 %vm160_vm1, %v72_v51 }
  0x80   :  { %2836 = vmatmul.mubr.msk.f32.gmra.mxu1 %vm160_vm1, %v135_v52 }
  0x81   :  { %2838 = vmatprep.mubr.msk.f32.mxu1 %vm160_vm1, %v136_v53 }
  0x82   :  { %2743 = vmatmul.mubr.msk.f32.gmra.mxu0 %vm160_vm1, %v73_v54 }
  0x83   :  { %2745 = vmatprep.mubr.msk.f32.mxu0 %vm160_vm1, %v74_v55 }
  0x84   :  { %2839 = vmatmul.mubr.msk.f32.gmra.mxu1 %vm160_vm1, %v137_v56 }
  0x85   :  { %2841 = vmatprep.mubr.msk.f32.mxu1 %vm160_vm1, %v138_v57 }
  0x86   :  { %2746 = vmatmul.mubr.msk.f32.gmra.mxu0 %vm160_vm1, %v75_v58 }
  0x87   :  { %2748 = vmatprep.mubr.msk.f32.mxu0 %vm160_vm1, %v76_v59 }
  0x88   :  { %2842 = vmatmul.mubr.msk.f32.gmra.mxu1 %vm160_vm1, %v139_v60 }
  0x89   :  { %2844 = vmatprep.mubr.msk.f32.mxu1 %vm160_vm1, %v140_v61 }
  0x8a   :  { %2749 = vmatmul.mubr.msk.f32.gmra.mxu0 %vm160_vm1, %v77_v62 }
  0x8b   :  { %2751 = vmatprep.mubr.msk.f32.mxu0 %vm160_vm1, %v78_v63 }
  0x8c   :  { %2845 = vmatmul.mubr.msk.f32.gmra.mxu1 %vm160_vm1, %v141_v0 }
  0x8d   :  { %2847 = vmatprep.mubr.msk.f32.mxu1 %vm160_vm1, %v142_v1 }
  0x8e   :  { %2752 = vmatmul.mubr.msk.f32.gmra.mxu0 %vm160_vm1, %v79_v2 }
  0x8f   :  { %2754 = vmatprep.mubr.msk.f32.mxu0 %vm160_vm1, %v80_v3 }
  0x90   :  { %2848 = vmatmul.mubr.msk.f32.gmra.mxu1 %vm160_vm1, %v143_v4 }
  0x91   :  { %2850 = vmatprep.mubr.msk.f32.mxu1 %vm160_vm1, %v144_v5 }
  0x92   :  { %2755 = vmatmul.mubr.msk.f32.gmra.mxu0 %vm160_vm1, %v81_v6 }
  0x93   :  { %2757 = vmatprep.mubr.msk.f32.mxu0 %vm160_vm1, %v82_v7 }
  0x94   :  { %2851 = vmatmul.mubr.msk.f32.gmra.mxu1 %vm160_vm1, %v145_v8 }
  0x95   :  { %2853 = vmatprep.mubr.msk.f32.mxu1 %vm160_vm1, %v146_v9 }
  0x96   :  { %2758 = vmatmul.mubr.msk.f32.gmra.mxu0 %vm160_vm1, %v83_v10 }
  0x98   :  { %2854 = vmatmul.mubr.msk.f32.gmra.mxu1 %vm160_vm1, %v147_v11 }
  0x99   :  { %2856 = vmatprep.mubr.msk.f32.mxu1 %vm160_vm1, %v148_v12 }
  0x9c   :  { %2857 = vmatmul.mubr.msk.f32.gmra.mxu1 %vm160_vm1, %v149_v13 }
  0x9d   :  { %2859 = vmatprep.mubr.msk.f32.mxu1 %vm160_vm1, %v150_v14 }
  0xa0   :  { %2860 = vmatmul.mubr.msk.f32.gmra.mxu1 %vm160_vm1, %v151_v15 }
  0xa1   :  { %2862 = vmatprep.mubr.msk.f32.mxu1 %vm160_vm1, %v152_v16 }
  0xa4   :  { %2863 = vmatmul.mubr.msk.f32.gmra.mxu1 %vm160_vm1, %v153_v17 }
  0xa5   :  { %2865 = vmatprep.mubr.msk.f32.mxu1 %vm160_vm1, %v154_v18 }
  0xa8   :  { %2866 = vmatmul.mubr.msk.f32.gmra.mxu1 %vm160_vm1, %v155_v19 }
  0xca   :  { %v3509_v20 = vpop.f32.mrf.mxu0 }
  0xcb   :  { %v1534_v24 = vmul.f32 %v3509_v20, %v3509_v20 }
  0xcc   :  { %v3511_v21 = vpop.f32.mrf.mxu0  ;;  %v3553_v51 = vpop.f32.mrf.mxu1 }
  0xcd   :  { %v1533_v22 = vmul.f32 %v3511_v21, %v3511_v21  ;;  %v1382_v25 = vadd.f32 %v3509_v20, %v3511_v21  ;;  %5811 = vst [vmem:[#allocation6_spill] sm:$0xff] %v3553_v51 }
  0xce   :  { %v3515_v23 = vpop.f32.mrf.mxu0  ;;  %v3560_v56 = vpop.f32.mrf.mxu1 }
  0xcf   :  { %v1677_v27 = vadd.f32 %v1534_v24, %v1533_v22  ;;  %v1536_v31 = vmul.f32 %v3515_v23, %v3515_v23  ;;  %5813 = vst [vmem:[#allocation8_spill] sm:$0xff] %v3560_v56 }
  0xd0   :  { %v3521_v26 = vpop.f32.mrf.mxu0  ;;  %v3567_v61 = vpop.f32.mrf.mxu1 }
  0xd1   :  { %v1383_v28 = vadd.f32 %v1382_v25, %v3521_v26  ;;  %v1535_v29 = vmul.f32 %v3521_v26, %v3521_v26 }
  0xd2   :  { %v3526_v30 = vpop.f32.mrf.mxu0  ;;  %v3574_v2 = vpop.f32.mrf.mxu1 }
  0xd3   :  { %v1384_v32 = vadd.f32 %v3515_v23, %v1383_v28  ;;  %v1678_v33 = vadd.f32 %v1677_v27, %v1535_v29  ;;  %v1538_v39 = vmul.f32 %v3526_v30, %v3526_v30  ;;  %5816 = vst [vmem:[#allocation11_spill] sm:$0xff] %v3574_v2 }
  0xd4   :  { %v3531_v34 = vpop.f32.mrf.mxu0 }
  0xd5   :  { %v1679_v35 = vadd.f32 %v1678_v33, %v1536_v31  ;;  %v1385_v36 = vadd.f32 %v1384_v32, %v3531_v34  ;;  %v1537_v37 = vmul.f32 %v3531_v34, %v3531_v34 }
  0xd6   :  { %v3536_v38 = vpop.f32.mrf.mxu0 }
  0xd7   :  { %v1386_v40 = vadd.f32 %v3526_v30, %v1385_v36  ;;  %v1680_v41 = vadd.f32 %v1679_v35, %v1537_v37  ;;  %v1540_v47 = vmul.f32 %v3536_v38, %v3536_v38 }
  0xd8   :  { %v3541_v42 = vpop.f32.mrf.mxu0 }
  0xd9   :  { %v1681_v43 = vadd.f32 %v1680_v41, %v1538_v39  ;;  %v1387_v44 = vadd.f32 %v1386_v40, %v3541_v42  ;;  %v1539_v45 = vmul.f32 %v3541_v42, %v3541_v42 }
  0xda   :  { %v3546_v46 = vpop.f32.mrf.mxu0 }
  0xdb   :  { %5810 = vst [vmem:[#allocation5_spill] sm:$0xff] %v3546_v46  ;;  %v1388_v48 = vadd.f32 %v3536_v38, %v1387_v44  ;;  %v1682_v49 = vadd.f32 %v1681_v43, %v1539_v45  ;;  %v1542_v57 = vmul.f32 %v3546_v46, %v3546_v46 }
  0xdc   :  { %v3551_v50 = vpop.f32.mrf.mxu0 }
  0xdd   :  { %v1683_v52 = vadd.f32 %v1682_v49, %v1540_v47  ;;  %v1389_v53 = vadd.f32 %v1388_v48, %v3551_v50  ;;  %v1541_v54 = vmul.f32 %v3551_v50, %v3551_v50 }
  0xde   :  { %v3558_v55 = vpop.f32.mrf.mxu0 }
  0xdf   :  { %5812 = vst [vmem:[#allocation7_spill] sm:$0xff] %v3558_v55  ;;  %v1390_v58 = vadd.f32 %v3546_v46, %v1389_v53  ;;  %v1684_v59 = vadd.f32 %v1683_v52, %v1541_v54  ;;  %v1544_v3 = vmul.f32 %v3558_v55, %v3558_v55 }
  0xe0   :  { %v3565_v60 = vpop.f32.mrf.mxu0 }
  0xe1   :  { %5814 = vst [vmem:[#allocation9_spill] sm:$0xff] %v3565_v60  ;;  %v1685_v62 = vadd.f32 %v1684_v59, %v1542_v57  ;;  %v1391_v63 = vadd.f32 %v1390_v58, %v3565_v60  ;;  %v1543_v0 = vmul.f32 %v3565_v60, %v3565_v60 }
  0xe2   :  { %v3572_v1 = vpop.f32.mrf.mxu0 }
  0xe3   :  { %5815 = vst [vmem:[#allocation10_spill] sm:$0xff] %v3572_v1  ;;  %v1392_v4 = vadd.f32 %v3558_v55, %v1391_v63  ;;  %v1686_v5 = vadd.f32 %v1685_v62, %v1543_v0  ;;  %v1546_v13 = vmul.f32 %v3572_v1, %v3572_v1 }
  0xe4   :  { %v3579_v6 = vpop.f32.mrf.mxu0  ;;  %v3581_v7 = vpop.f32.mrf.mxu1 }
  0xe5   :  { %5817 = vst [vmem:[#allocation12_spill] sm:$0xff] %v3579_v6  ;;  %v1687_v8 = vadd.f32 %v1686_v5, %v1544_v3  ;;  %v1393_v9 = vadd.f32 %v1392_v4, %v3579_v6  ;;  %v1545_v10 = vmul.f32 %v3579_v6, %v3579_v6 }
  0xe6   :  { %v3586_v11 = vpop.f32.mrf.mxu0  ;;  %v3588_v12 = vpop.f32.mrf.mxu1 }
  0xe7   :  { %5818 = vst [vmem:[#allocation13_spill] sm:$0xff] %v3586_v11  ;;  %5819 = vst [vmem:[#allocation14_spill] sm:$0xff] %v3588_v12  ;;  %v1394_v14 = vadd.f32 %v3572_v1, %v1393_v9  ;;  %v1688_v15 = vadd.f32 %v1687_v8, %v1545_v10  ;;  %v1548_v27 = vmul.f32 %v3586_v11, %v3586_v11 }
  0xe8   :  { %v3593_v16 = vpop.f32.mrf.mxu0  ;;  %v3595_v17 = vpop.f32.mrf.mxu1 }
  0xe9   :  { %5820 = vst [vmem:[#allocation15_spill] sm:$0xff] %v3593_v16  ;;  %5821 = vst [vmem:[#allocation16_spill] sm:$0xff] %v3595_v17  ;;  %v1689_v18 = vadd.f32 %v1688_v15, %v1546_v13  ;;  %v1395_v19 = vadd.f32 %v1394_v14, %v3593_v16  ;;  %v1547_v22 = vmul.f32 %v3593_v16, %v3593_v16 }
  0xea   :  { %v3600_v24 = vpop.f32.mrf.mxu0  ;;  %v3602_v25 = vpop.f32.mrf.mxu1 }
  0xeb   :  { %5822 = vst [vmem:[#allocation17_spill] sm:$0xff] %v3600_v24  ;;  %5823 = vst [vmem:[#allocation18_spill] sm:$0xff] %v3602_v25  ;;  %v1690_v28 = vadd.f32 %v1689_v18, %v1547_v22  ;;  %v1396_v29 = vadd.f32 %v3586_v11, %v1395_v19  ;;  %v1550_v40 = vmul.f32 %v3600_v24, %v3600_v24 }
  0xec   :  { %v3607_v31 = vpop.f32.mrf.mxu0  ;;  %v3609_v32 = vpop.f32.mrf.mxu1 }
  0xed   :  { %5824 = vst [vmem:[#allocation19_spill] sm:$0xff] %v3607_v31  ;;  %5825 = vst [vmem:[#allocation20_spill] sm:$0xff] %v3609_v32  ;;  %v1397_v33 = vadd.f32 %v1396_v29, %v3607_v31  ;;  %v1549_v35 = vmul.f32 %v3607_v31, %v3607_v31  ;;  %v1691_v36 = vadd.f32 %v1690_v28, %v1548_v27 }
  0xee   :  { %v3614_v37 = vpop.f32.mrf.mxu0  ;;  %v3616_v39 = vpop.f32.mrf.mxu1 }
  0xef   :  { %5826 = vst [vmem:[#allocation21_spill] sm:$0xff] %v3614_v37  ;;  %5827 = vst [vmem:[#allocation22_spill] sm:$0xff] %v3616_v39  ;;  %v1692_v41 = vadd.f32 %v1691_v36, %v1549_v35  ;;  %v1398_v43 = vadd.f32 %v3600_v24, %v1397_v33  ;;  %v1552_v53 = vmul.f32 %v3614_v37, %v3614_v37 }
  0xf0   :  { %v3621_v44 = vpop.f32.mrf.mxu0  ;;  %v3628_v52 = vpop.f32.mrf.mxu1 }
  0xf1   :  { %5828 = vst [vmem:[#allocation23_spill] sm:$0xff] %v3621_v44  ;;  %v1399_v45 = vadd.f32 %v1398_v43, %v3621_v44  ;;  %v1551_v47 = vmul.f32 %v3621_v44, %v3621_v44  ;;  %v1693_v48 = vadd.f32 %v1692_v41, %v1550_v40 }
  0xf2   :  { %v3626_v49 = vpop.f32.mrf.mxu0  ;;  %v3640_v3 = vpop.f32.mrf.mxu1 }
  0xf3   :  { %5829 = vst [vmem:[#allocation24_spill] sm:$0xff] %v3626_v49  ;;  %v1694_v54 = vadd.f32 %v1693_v48, %v1551_v47  ;;  %v1400_v57 = vadd.f32 %v3614_v37, %v1399_v45  ;;  %v1554_v4 = vmul.f32 %v3626_v49, %v3626_v49 }
  0xf4   :  { %v3633_v58 = vpop.f32.mrf.mxu0  ;;  %v3652_v18 = vpop.f32.mrf.mxu1 }
  0xf5   :  { %5830 = vst [vmem:[#allocation25_spill] sm:$0xff] %v3633_v58  ;;  %v1401_v59 = vadd.f32 %v1400_v57, %v3633_v58  ;;  %v1553_v62 = vmul.f32 %v3633_v58, %v3633_v58  ;;  %v1695_v63 = vadd.f32 %v1694_v54, %v1552_v53  ;;  %5834 = vst [vmem:[#allocation29_spill] sm:$0xff] %v3652_v18 }
  0xf6   :  { %v3638_v0 = vpop.f32.mrf.mxu0  ;;  %v3664_v40 = vpop.f32.mrf.mxu1 }
  0xf7   :  { %5831 = vst [vmem:[#allocation26_spill] sm:$0xff] %v3638_v0  ;;  %v1696_v5 = vadd.f32 %v1695_v63, %v1553_v62  ;;  %v1402_v8 = vadd.f32 %v3626_v49, %v1401_v59  ;;  %v1556_v19 = vmul.f32 %v3638_v0, %v3638_v0  ;;  %5837 = vst [vmem:[#allocation32_spill] sm:$0xff] %v3664_v40 }
  0xf8   :  { %v3645_v9 = vpop.f32.mrf.mxu0  ;;  %v3676_v59 = vpop.f32.mrf.mxu1 }
  0xf9   :  { %5832 = vst [vmem:[#allocation27_spill] sm:$0xff] %v3645_v9  ;;  %v1403_v10 = vadd.f32 %v1402_v8, %v3645_v9  ;;  %v1555_v13 = vmul.f32 %v3645_v9, %v3645_v9  ;;  %v1697_v14 = vadd.f32 %v1696_v5, %v1554_v4  ;;  %5840 = vst [vmem:[#allocation35_spill] sm:$0xff] %v3676_v59 }
  0xfa   :  { %v3650_v15 = vpop.f32.mrf.mxu0 }
  0xfb   :  { %5833 = vst [vmem:[#allocation28_spill] sm:$0xff] %v3650_v15  ;;  %v1698_v22 = vadd.f32 %v1697_v14, %v1555_v13  ;;  %v1404_v27 = vadd.f32 %v3638_v0, %v1403_v10  ;;  %v1558_v41 = vmul.f32 %v3650_v15, %v3650_v15 }
  0xfc   :  { %v3657_v28 = vpop.f32.mrf.mxu0 }
  0xfd   :  { %5835 = vst [vmem:[#allocation30_spill] sm:$0xff] %v3657_v28  ;;  %v1405_v29 = vadd.f32 %v1404_v27, %v3657_v28  ;;  %v1557_v33 = vmul.f32 %v3657_v28, %v3657_v28  ;;  %v1699_v35 = vadd.f32 %v1698_v22, %v1556_v19  ;;  %v3688_v19 = vpop.f32.mrf.mxu1 }
  0xfe   :  { %v3662_v36 = vpop.f32.mrf.mxu0  ;;  %5843 = vst [vmem:[#allocation38_spill] sm:$0xff] %v3688_v19 }
  0xff   :  { %5836 = vst [vmem:[#allocation31_spill] sm:$0xff] %v3662_v36  ;;  %v1700_v43 = vadd.f32 %v1699_v35, %v1557_v33  ;;  %v1406_v45 = vadd.f32 %v3650_v15, %v1405_v29  ;;  %v1560_v62 = vmul.f32 %v3662_v36, %v3662_v36 }
 0x100   :  { %v3669_v47 = vpop.f32.mrf.mxu0 }
 0x101   :  { %5838 = vst [vmem:[#allocation33_spill] sm:$0xff] %v3669_v47  ;;  %v1407_v48 = vadd.f32 %v1406_v45, %v3669_v47  ;;  %v1559_v53 = vmul.f32 %v3669_v47, %v3669_v47  ;;  %v1701_v54 = vadd.f32 %v1700_v43, %v1558_v41 }
 0x102   :  { %v3674_v57 = vpop.f32.mrf.mxu0 }
 0x103   :  { %5839 = vst [vmem:[#allocation34_spill] sm:$0xff] %v3674_v57  ;;  %v1702_v63 = vadd.f32 %v1701_v54, %v1559_v53  ;;  %v1408_v4 = vadd.f32 %v3662_v36, %v1407_v48  ;;  %v1562_v22 = vmul.f32 %v3674_v57, %v3674_v57  ;;  %v3700_v48 = vpop.f32.mrf.mxu1 }
 0x104   :  { %v3681_v5 = vpop.f32.mrf.mxu0  ;;  %5846 = vst [vmem:[#allocation41_spill] sm:$0xff] %v3700_v48 }
 0x105   :  { %5841 = vst [vmem:[#allocation36_spill] sm:$0xff] %v3681_v5  ;;  %v1409_v8 = vadd.f32 %v1408_v4, %v3681_v5  ;;  %v1561_v10 = vmul.f32 %v3681_v5, %v3681_v5  ;;  %v1703_v13 = vadd.f32 %v1702_v63, %v1560_v62 }
 0x106   :  { %v3686_v14 = vpop.f32.mrf.mxu0 }
 0x107   :  { %5842 = vst [vmem:[#allocation37_spill] sm:$0xff] %v3686_v14  ;;  %v1704_v27 = vadd.f32 %v1703_v13, %v1561_v10  ;;  %v1410_v29 = vadd.f32 %v3674_v57, %v1409_v8  ;;  %v1564_v53 = vmul.f32 %v3686_v14, %v3686_v14 }
 0x108   :  { %v3693_v33 = vpop.f32.mrf.mxu0 }
 0x109   :  { %5844 = vst [vmem:[#allocation39_spill] sm:$0xff] %v3693_v33  ;;  %v1411_v35 = vadd.f32 %v1410_v29, %v3693_v33  ;;  %v1563_v41 = vmul.f32 %v3693_v33, %v3693_v33  ;;  %v1705_v43 = vadd.f32 %v1704_v27, %v1562_v22  ;;  %v3712_v22 = vpop.f32.mrf.mxu1 }
 0x10a   :  { %v3698_v45 = vpop.f32.mrf.mxu0  ;;  %5849 = vst [vmem:[#allocation44_spill] sm:$0xff] %v3712_v22 }
 0x10b   :  { %5845 = vst [vmem:[#allocation40_spill] sm:$0xff] %v3698_v45  ;;  %v1706_v54 = vadd.f32 %v1705_v43, %v1563_v41  ;;  %v1412_v62 = vadd.f32 %v3686_v14, %v1411_v35  ;;  %v1566_v27 = vmul.f32 %v3698_v45, %v3698_v45 }
 0x10c   :  { %v3705_v63 = vpop.f32.mrf.mxu0 }
 0x10d   :  { %5847 = vst [vmem:[#allocation42_spill] sm:$0xff] %v3705_v63  ;;  %v1413_v4 = vadd.f32 %v1412_v62, %v3705_v63  ;;  %v1565_v8 = vmul.f32 %v3705_v63, %v3705_v63  ;;  %v1707_v10 = vadd.f32 %v1706_v54, %v1564_v53  ;;  %v3724_v53 = vpop.f32.mrf.mxu1 }
 0x10e   :  { %v3710_v13 = vpop.f32.mrf.mxu0 }
 0x10f   :  { %5848 = vst [vmem:[#allocation43_spill] sm:$0xff] %v3710_v13  ;;  %v1708_v29 = vadd.f32 %v1707_v10, %v1565_v8  ;;  %v1414_v41 = vadd.f32 %v3698_v45, %v1413_v4  ;;  %v1568_v54 = vmul.f32 %v3710_v13, %v3710_v13 }
 0x110   :  { %v3717_v43 = vpop.f32.mrf.mxu0 }
 0x111   :  { %v1415_v35 = vadd.f32 %v1414_v41, %v3717_v43  ;;  %v1567_v62 = vmul.f32 %v3717_v43, %v3717_v43  ;;  %v1709_v14 = vadd.f32 %v1708_v29, %v1566_v27  ;;  %v3736_v27 = vpop.f32.mrf.mxu1 }
 0x112   :  { %v3722_v63 = vpop.f32.mrf.mxu0  ;;  %5853 = vst [vmem:[#allocation48_spill] sm:$0xff] %v3736_v27 }
 0x113   :  { %5850 = vst [vmem:[#allocation45_spill] sm:$0xff] %v3722_v63  ;;  %v1710_v33 = vadd.f32 %v1709_v14, %v1567_v62  ;;  %v1416_v8 = vadd.f32 %v3710_v13, %v1415_v35  ;;  %v1570_v29 = vmul.f32 %v3722_v63, %v3722_v63 }
 0x114   :  { %v3729_v10 = vpop.f32.mrf.mxu0 }
 0x115   :  { %5851 = vst [vmem:[#allocation46_spill] sm:$0xff] %v3729_v10  ;;  %v1417_v4 = vadd.f32 %v1416_v8, %v3729_v10  ;;  %v1569_v41 = vmul.f32 %v3729_v10, %v3729_v10  ;;  %v1711_v45 = vadd.f32 %v1710_v33, %v1568_v54  ;;  %v3748_v33 = vpop.f32.mrf.mxu1 }
 0x116   :  { %v3734_v57 = vpop.f32.mrf.mxu0  ;;  %5856 = vst [vmem:[#allocation51_spill] sm:$0xff] %v3748_v33 }
 0x117   :  { %5852 = vst [vmem:[#allocation47_spill] sm:$0xff] %v3734_v57  ;;  %v1712_v5 = vadd.f32 %v1711_v45, %v1569_v41  ;;  %v1418_v14 = vadd.f32 %v3722_v63, %v1417_v4  ;;  %v1572_v54 = vmul.f32 %v3734_v57, %v3734_v57 }
 0x118   :  { %v3741_v62 = vpop.f32.mrf.mxu0 }
 0x119   :  { %5854 = vst [vmem:[#allocation49_spill] sm:$0xff] %v3741_v62  ;;  %v1419_v35 = vadd.f32 %v1418_v14, %v3741_v62  ;;  %v1571_v8 = vmul.f32 %v3741_v62, %v3741_v62  ;;  %v1713_v13 = vadd.f32 %v1712_v5, %v1570_v29  ;;  %v3760_v5 = vpop.f32.mrf.mxu1 }
 0x11a   :  { %v3746_v10 = vpop.f32.mrf.mxu0  ;;  %5859 = vst [vmem:[#allocation54_spill] sm:$0xff] %v3760_v5 }
 0x11b   :  { %5855 = vst [vmem:[#allocation50_spill] sm:$0xff] %v3746_v10  ;;  %v1714_v36 = vadd.f32 %v1713_v13, %v1571_v8  ;;  %v1420_v45 = vadd.f32 %v3734_v57, %v1419_v35  ;;  %v1574_v29 = vmul.f32 %v3746_v10, %v3746_v10 }
 0x11c   :  { %v3753_v41 = vpop.f32.mrf.mxu0 }
 0x11d   :  { %5857 = vst [vmem:[#allocation52_spill] sm:$0xff] %v3753_v41  ;;  %v1421_v4 = vadd.f32 %v1420_v45, %v3753_v41  ;;  %v1573_v14 = vmul.f32 %v3753_v41, %v3753_v41  ;;  %v1715_v63 = vadd.f32 %v1714_v36, %v1572_v54  ;;  %v3772_v36 = vpop.f32.mrf.mxu1 }
 0x11e   :  { %v3758_v62 = vpop.f32.mrf.mxu0  ;;  %5862 = vst [vmem:[#allocation57_spill] sm:$0xff] %v3772_v36 }
 0x11f   :  { %5858 = vst [vmem:[#allocation53_spill] sm:$0xff] %v3758_v62  ;;  %v1716_v47 = vadd.f32 %v1715_v63, %v1573_v14  ;;  %v1422_v13 = vadd.f32 %v3746_v10, %v1421_v4  ;;  %v1576_v54 = vmul.f32 %v3758_v62, %v3758_v62 }
 0x120   :  { %v3765_v8 = vpop.f32.mrf.mxu0 }
 0x121   :  { %5860 = vst [vmem:[#allocation55_spill] sm:$0xff] %v3765_v8  ;;  %v1423_v35 = vadd.f32 %v1422_v13, %v3765_v8  ;;  %v1575_v45 = vmul.f32 %v3765_v8, %v3765_v8  ;;  %v1717_v57 = vadd.f32 %v1716_v47, %v1574_v29  ;;  %v3784_v47 = vpop.f32.mrf.mxu1 }
 0x122   :  { %v3770_v41 = vpop.f32.mrf.mxu0  ;;  %5865 = vst [vmem:[#allocation60_spill] sm:$0xff] %v3784_v47 }
 0x123   :  { %5861 = vst [vmem:[#allocation56_spill] sm:$0xff] %v3770_v41  ;;  %v1718_v15 = vadd.f32 %v1717_v57, %v1575_v45  ;;  %v1424_v63 = vadd.f32 %v3758_v62, %v1423_v35  ;;  %v1578_v29 = vmul.f32 %v3770_v41, %v3770_v41 }
 0x124   :  { %v3777_v14 = vpop.f32.mrf.mxu0 }
 0x125   :  { %5863 = vst [vmem:[#allocation58_spill] sm:$0xff] %v3777_v14  ;;  %v1425_v4 = vadd.f32 %v1424_v63, %v3777_v14  ;;  %v1577_v13 = vmul.f32 %v3777_v14, %v3777_v14  ;;  %v1719_v10 = vadd.f32 %v1718_v15, %v1576_v54  ;;  %v3796_v15 = vpop.f32.mrf.mxu1 }
 0x126   :  { %v3782_v8 = vpop.f32.mrf.mxu0  ;;  %5868 = vst [vmem:[#allocation63_spill] sm:$0xff] %v3796_v15 }
 0x127   :  { %5864 = vst [vmem:[#allocation59_spill] sm:$0xff] %v3782_v8  ;;  %v1720_v28 = vadd.f32 %v1719_v10, %v1577_v13  ;;  %v1426_v57 = vadd.f32 %v3770_v41, %v1425_v4  ;;  %v1580_v54 = vmul.f32 %v3782_v8, %v3782_v8 }
 0x128   :  { %v3789_v45 = vpop.f32.mrf.mxu0 }
 0x129   :  { %5866 = vst [vmem:[#allocation61_spill] sm:$0xff] %v3789_v45  ;;  %v1427_v35 = vadd.f32 %v1426_v57, %v3789_v45  ;;  %v1579_v63 = vmul.f32 %v3789_v45, %v3789_v45  ;;  %v1721_v62 = vadd.f32 %v1720_v28, %v1578_v29  ;;  %v3808_v28 = vpop.f32.mrf.mxu1 }
 0x12a   :  { %v3794_v14 = vpop.f32.mrf.mxu0  ;;  %5871 = vst [vmem:[#allocation66_spill] sm:$0xff] %v3808_v28 }
 0x12b   :  { %5867 = vst [vmem:[#allocation62_spill] sm:$0xff] %v3794_v14  ;;  %v1722_v0 = vadd.f32 %v1721_v62, %v1579_v63  ;;  %v1428_v10 = vadd.f32 %v3782_v8, %v1427_v35  ;;  %v1582_v29 = vmul.f32 %v3794_v14, %v3794_v14 }
 0x12c   :  { %v3801_v13 = vpop.f32.mrf.mxu0 }
 0x12d   :  { %5869 = vst [vmem:[#allocation64_spill] sm:$0xff] %v3801_v13  ;;  %v1429_v4 = vadd.f32 %v1428_v10, %v3801_v13  ;;  %v1581_v57 = vmul.f32 %v3801_v13, %v3801_v13  ;;  %v1723_v41 = vadd.f32 %v1722_v0, %v1580_v54  ;;  %v3820_v0 = vpop.f32.mrf.mxu1 }
 0x12e   :  { %v3806_v45 = vpop.f32.mrf.mxu0 }
 0x12f   :  { %5870 = vst [vmem:[#allocation65_spill] sm:$0xff] %v3806_v45  ;;  %v1724_v9 = vadd.f32 %v1723_v41, %v1581_v57  ;;  %v1430_v62 = vadd.f32 %v3794_v14, %v1429_v4  ;;  %v1584_v54 = vmul.f32 %v3806_v45, %v3806_v45 }
 0x130   :  { %v3813_v63 = vpop.f32.mrf.mxu0 }
 0x131   :  { %5872 = vst [vmem:[#allocation67_spill] sm:$0xff] %v3813_v63  ;;  %v1431_v35 = vadd.f32 %v1430_v62, %v3813_v63  ;;  %v1583_v10 = vmul.f32 %v3813_v63, %v3813_v63  ;;  %v1725_v8 = vadd.f32 %v1724_v9, %v1582_v29  ;;  %v3832_v9 = vpop.f32.mrf.mxu1 }
 0x132   :  { %v3818_v13 = vpop.f32.mrf.mxu0  ;;  %5876 = vst [vmem:[#allocation71_spill] sm:$0xff] %v3832_v9 }
 0x133   :  { %5873 = vst [vmem:[#allocation68_spill] sm:$0xff] %v3818_v13  ;;  %v1726_v49 = vadd.f32 %v1725_v8, %v1583_v10  ;;  %v1432_v41 = vadd.f32 %v3806_v45, %v1431_v35  ;;  %v1586_v29 = vmul.f32 %v3818_v13, %v3818_v13 }
 0x134   :  { %v3825_v57 = vpop.f32.mrf.mxu0 }
 0x135   :  { %5874 = vst [vmem:[#allocation69_spill] sm:$0xff] %v3825_v57  ;;  %v1433_v4 = vadd.f32 %v1432_v41, %v3825_v57  ;;  %v1585_v62 = vmul.f32 %v3825_v57, %v3825_v57  ;;  %v1727_v14 = vadd.f32 %v1726_v49, %v1584_v54  ;;  %v3844_v49 = vpop.f32.mrf.mxu1 }
 0x136   :  { %v3830_v63 = vpop.f32.mrf.mxu0 }
 0x137   :  { %5875 = vst [vmem:[#allocation70_spill] sm:$0xff] %v3830_v63  ;;  %v1728_v58 = vadd.f32 %v1727_v14, %v1585_v62  ;;  %v1434_v8 = vadd.f32 %v3818_v13, %v1433_v4  ;;  %v1588_v54 = vmul.f32 %v3830_v63, %v3830_v63 }
 0x138   :  { %v3837_v10 = vpop.f32.mrf.mxu0 }
 0x139   :  { %5877 = vst [vmem:[#allocation72_spill] sm:$0xff] %v3837_v10  ;;  %v1435_v35 = vadd.f32 %v1434_v8, %v3837_v10  ;;  %v1587_v41 = vmul.f32 %v3837_v10, %v3837_v10  ;;  %v1729_v45 = vadd.f32 %v1728_v58, %v1586_v29  ;;  %v3856_v58 = vpop.f32.mrf.mxu1 }
 0x13a   :  { %v3842_v57 = vpop.f32.mrf.mxu0  ;;  %5881 = vst [vmem:[#allocation76_spill] sm:$0xff] %v3856_v58 }
 0x13b   :  { %5878 = vst [vmem:[#allocation73_spill] sm:$0xff] %v3842_v57  ;;  %v1730_v37 = vadd.f32 %v1729_v45, %v1587_v41  ;;  %v1436_v14 = vadd.f32 %v3830_v63, %v1435_v35  ;;  %v1590_v29 = vmul.f32 %v3842_v57, %v3842_v57 }
 0x13c   :  { %v3849_v62 = vpop.f32.mrf.mxu0 }
 0x13d   :  { %5879 = vst [vmem:[#allocation74_spill] sm:$0xff] %v3849_v62  ;;  %v1437_v4 = vadd.f32 %v1436_v14, %v3849_v62  ;;  %v1589_v8 = vmul.f32 %v3849_v62, %v3849_v62  ;;  %v1731_v13 = vadd.f32 %v1730_v37, %v1588_v54  ;;  %v3868_v37 = vpop.f32.mrf.mxu1 }
 0x13e   :  { %v3854_v10 = vpop.f32.mrf.mxu0 }
 0x13f   :  { %5880 = vst [vmem:[#allocation75_spill] sm:$0xff] %v3854_v10  ;;  %v1732_v44 = vadd.f32 %v1731_v13, %v1589_v8  ;;  %v1438_v45 = vadd.f32 %v3842_v57, %v1437_v4  ;;  %v1592_v54 = vmul.f32 %v3854_v10, %v3854_v10 }
 0x140   :  { %v3861_v41 = vpop.f32.mrf.mxu0 }
 0x141   :  { %5882 = vst [vmem:[#allocation77_spill] sm:$0xff] %v3861_v41  ;;  %v1439_v35 = vadd.f32 %v1438_v45, %v3861_v41  ;;  %v1591_v14 = vmul.f32 %v3861_v41, %v3861_v41  ;;  %v1733_v63 = vadd.f32 %v1732_v44, %v1590_v29  ;;  %v3880_v44 = vpop.f32.mrf.mxu1 }
 0x142   :  { %v3866_v62 = vpop.f32.mrf.mxu0  ;;  %5886 = vst [vmem:[#allocation81_spill] sm:$0xff] %v3880_v44 }
 0x143   :  { %5883 = vst [vmem:[#allocation78_spill] sm:$0xff] %v3866_v62  ;;  %v1734_v24 = vadd.f32 %v1733_v63, %v1591_v14  ;;  %v1440_v13 = vadd.f32 %v3854_v10, %v1439_v35  ;;  %v1594_v29 = vmul.f32 %v3866_v62, %v3866_v62 }
 0x144   :  { %v3873_v8 = vpop.f32.mrf.mxu0 }
 0x145   :  { %5884 = vst [vmem:[#allocation79_spill] sm:$0xff] %v3873_v8  ;;  %v1441_v4 = vadd.f32 %v1440_v13, %v3873_v8  ;;  %v1593_v45 = vmul.f32 %v3873_v8, %v3873_v8  ;;  %v1735_v57 = vadd.f32 %v1734_v24, %v1592_v54  ;;  %v3892_v24 = vpop.f32.mrf.mxu1 }
 0x146   :  { %v3878_v41 = vpop.f32.mrf.mxu0  ;;  %5889 = vst [vmem:[#allocation84_spill] sm:$0xff] %v3892_v24 }
 0x147   :  { %5885 = vst [vmem:[#allocation80_spill] sm:$0xff] %v3878_v41  ;;  %v1736_v31 = vadd.f32 %v1735_v57, %v1593_v45  ;;  %v1442_v63 = vadd.f32 %v3866_v62, %v1441_v4  ;;  %v1596_v54 = vmul.f32 %v3878_v41, %v3878_v41 }
 0x148   :  { %v3885_v14 = vpop.f32.mrf.mxu0 }
 0x149   :  { %5887 = vst [vmem:[#allocation82_spill] sm:$0xff] %v3885_v14  ;;  %v1443_v35 = vadd.f32 %v1442_v63, %v3885_v14  ;;  %v1595_v13 = vmul.f32 %v3885_v14, %v3885_v14  ;;  %v1737_v10 = vadd.f32 %v1736_v31, %v1594_v29  ;;  %v3904_v31 = vpop.f32.mrf.mxu1 }
 0x14a   :  { %v3890_v8 = vpop.f32.mrf.mxu0  ;;  %5892 = vst [vmem:[#allocation87_spill] sm:$0xff] %v3904_v31 }
 0x14b   :  { %5888 = vst [vmem:[#allocation83_spill] sm:$0xff] %v3890_v8  ;;  %v1738_v11 = vadd.f32 %v1737_v10, %v1595_v13  ;;  %v1444_v57 = vadd.f32 %v3878_v41, %v1443_v35  ;;  %v1598_v29 = vmul.f32 %v3890_v8, %v3890_v8 }
 0x14c   :  { %v3897_v45 = vpop.f32.mrf.mxu0 }
 0x14d   :  { %5890 = vst [vmem:[#allocation85_spill] sm:$0xff] %v3897_v45  ;;  %v1445_v4 = vadd.f32 %v1444_v57, %v3897_v45  ;;  %v1597_v63 = vmul.f32 %v3897_v45, %v3897_v45  ;;  %v1739_v62 = vadd.f32 %v1738_v11, %v1596_v54  ;;  %v3916_v11 = vpop.f32.mrf.mxu1 }
 0x14e   :  { %v3902_v14 = vpop.f32.mrf.mxu0  ;;  %5895 = vst [vmem:[#allocation90_spill] sm:$0xff] %v3916_v11 }
 0x14f   :  { %5891 = vst [vmem:[#allocation86_spill] sm:$0xff] %v3902_v14  ;;  %v1740_v16 = vadd.f32 %v1739_v62, %v1597_v63  ;;  %v1446_v10 = vadd.f32 %v3890_v8, %v1445_v4  ;;  %v1600_v54 = vmul.f32 %v3902_v14, %v3902_v14 }
 0x150   :  { %v3909_v13 = vpop.f32.mrf.mxu0 }
 0x151   :  { %5893 = vst [vmem:[#allocation88_spill] sm:$0xff] %v3909_v13  ;;  %v1447_v35 = vadd.f32 %v1446_v10, %v3909_v13  ;;  %v1599_v57 = vmul.f32 %v3909_v13, %v3909_v13  ;;  %v1741_v41 = vadd.f32 %v1740_v16, %v1598_v29  ;;  %v3928_v16 = vpop.f32.mrf.mxu1 }
 0x152   :  { %v3914_v45 = vpop.f32.mrf.mxu0 }
 0x153   :  { %5894 = vst [vmem:[#allocation89_spill] sm:$0xff] %v3914_v45  ;;  %v1742_v1 = vadd.f32 %v1741_v41, %v1599_v57  ;;  %v1448_v62 = vadd.f32 %v3902_v14, %v1447_v35  ;;  %v1602_v29 = vmul.f32 %v3914_v45, %v3914_v45 }
 0x154   :  { %v3921_v63 = vpop.f32.mrf.mxu0 }
 0x155   :  { %5896 = vst [vmem:[#allocation91_spill] sm:$0xff] %v3921_v63  ;;  %v1449_v4 = vadd.f32 %v1448_v62, %v3921_v63  ;;  %v1601_v10 = vmul.f32 %v3921_v63, %v3921_v63  ;;  %v1743_v8 = vadd.f32 %v1742_v1, %v1600_v54  ;;  %v3938_v63 = vpop.f32.mrf.mxu1 }
 0x156   :  { %v3926_v13 = vpop.f32.mrf.mxu0  ;;  %5898 = vst [vmem:[#allocation93_spill] sm:$0xff] %v3938_v63 }
 0x157   :  { %5897 = vst [vmem:[#allocation92_spill] sm:$0xff] %v3926_v13  ;;  %v1744_v6 = vadd.f32 %v1743_v8, %v1601_v10  ;;  %v1450_v41 = vadd.f32 %v3914_v45, %v1449_v4  ;;  %v1604_v1 = vmul.f32 %v3926_v13, %v3926_v13  ;;  %v1605_v4 = vmul.f32 %v3560_v56, %v3560_v56  ;;  %v3946_v10 = vpop.f32.mrf.mxu1 }
 0x158   :  { %v3933_v57 = vpop.f32.mrf.mxu0  ;;  %5899 = vst [vmem:[#allocation94_spill] sm:$0xff] %v3946_v10 }
 0x159   :  { %v1451_v35 = vadd.f32 %v1450_v41, %v3933_v57  ;;  %v1603_v62 = vmul.f32 %v3933_v57, %v3933_v57  ;;  %v1745_v14 = vadd.f32 %v1744_v6, %v1602_v29  ;;  %v1606_v41 = vmul.f32 %v3553_v51, %v3553_v51 }
 0x15b   :  { %v1452_v54 = vadd.f32 %v3926_v13, %v1451_v35  ;;  %v1746_v55 = vadd.f32 %v1745_v14, %v1603_v62  ;;  %v1607_v14 = vmul.f32 %v3574_v2, %v3574_v2  ;;  %v1608_v35 = vmul.f32 %v3567_v61, %v3567_v61 }
 0x15d   :  { %v1747_v60 = vadd.f32 %v1746_v55, %v1604_v1  ;;  %v1453_v8 = vadd.f32 %v1452_v54, %v3560_v56  ;;  %v3954_v55 = vpop.f32.mrf.mxu1 }
 0x15e   :  { %5900 = vst [vmem:[#allocation95_spill] sm:$0xff] %v3954_v55 }
 0x15f   :  { %v1454_v6 = vadd.f32 %v3553_v51, %v1453_v8  ;;  %v1748_v29 = vadd.f32 %v1747_v60, %v1605_v4  ;;  %v1609_v60 = vmul.f32 %v3588_v12, %v3588_v12  ;;  %v3962_v8 = vpop.f32.mrf.mxu1  ;;  %v1610_v4 = vmul.f32 %v3581_v7, %v3581_v7  ;;  %v6005_v51 = vld [vmem:[#allocation60_spill] sm:$0xff] }
 0x160   :  { %5901 = vst [vmem:[#allocation96_spill] sm:$0xff] %v3962_v8 }
 0x161   :  { %v1749_v45 = vadd.f32 %v1748_v29, %v1606_v41  ;;  %v1455_v46 = vadd.f32 %v1454_v6, %v3574_v2 }
 0x163   :  { %v1456_v62 = vadd.f32 %v3567_v61, %v1455_v46  ;;  %v1750_v1 = vadd.f32 %v1749_v45, %v1607_v14  ;;  %v1611_v46 = vmul.f32 %v3602_v25, %v3602_v25  ;;  %v3970_v45 = vpop.f32.mrf.mxu1  ;;  %v1612_v14 = vmul.f32 %v3595_v17, %v3595_v17 }
 0x165   :  { %v1751_v54 = vadd.f32 %v1750_v1, %v1608_v35  ;;  %v1457_v56 = vadd.f32 %v1456_v62, %v3588_v12 }
 0x167   :  { %v1458_v41 = vadd.f32 %v3581_v7, %v1457_v56  ;;  %v1752_v6 = vadd.f32 %v1751_v54, %v1609_v60  ;;  %v1613_v56 = vmul.f32 %v3616_v39, %v3616_v39  ;;  %v3978_v54 = vpop.f32.mrf.mxu1  ;;  %v1614_v60 = vmul.f32 %v3609_v32, %v3609_v32 }
 0x168   :  { %5902 = vst [vmem:[#allocation97_spill] sm:$0xff] %v3978_v54 }
 0x169   :  { %v1753_v29 = vadd.f32 %v1752_v6, %v1610_v4  ;;  %v1459_v2 = vadd.f32 %v1458_v41, %v3602_v25 }
 0x16b   :  { %v1460_v35 = vadd.f32 %v3595_v17, %v1459_v2  ;;  %v1754_v62 = vadd.f32 %v1753_v29, %v1611_v46  ;;  %v1615_v2 = vmul.f32 %v3640_v3, %v3640_v3  ;;  %v3986_v29 = vpop.f32.mrf.mxu1  ;;  %v1616_v46 = vmul.f32 %v3628_v52, %v3628_v52 }
 0x16c   :  { %5903 = vst [vmem:[#allocation98_spill] sm:$0xff] %v3986_v29 }
 0x16d   :  { %v1755_v1 = vadd.f32 %v1754_v62, %v1612_v14  ;;  %v1461_v12 = vadd.f32 %v1460_v35, %v3616_v39 }
 0x16f   :  { %v1462_v4 = vadd.f32 %v3609_v32, %v1461_v12  ;;  %v1756_v41 = vadd.f32 %v1755_v1, %v1613_v56  ;;  %v1617_v12 = vmul.f32 %v3664_v40, %v3664_v40  ;;  %v3994_v1 = vpop.f32.mrf.mxu1  ;;  %v1618_v56 = vmul.f32 %v3652_v18, %v3652_v18 }
 0x170   :  { %5904 = vst [vmem:[#allocation99_spill] sm:$0xff] %v3994_v1 }
 0x171   :  { %v1757_v6 = vadd.f32 %v1756_v41, %v1614_v60  ;;  %v1463_v25 = vadd.f32 %v1462_v4, %v3640_v3 }
 0x173   :  { %v1464_v14 = vadd.f32 %v3628_v52, %v1463_v25  ;;  %v1758_v35 = vadd.f32 %v1757_v6, %v1615_v2  ;;  %v1619_v25 = vmul.f32 %v3688_v19, %v3688_v19  ;;  %v4002_v2 = vpop.f32.mrf.mxu1 }
 0x174   :  { %5905 = vst [vmem:[#allocation100_spill] sm:$0xff] %v4002_v2 }
 0x175   :  { %v1759_v62 = vadd.f32 %v1758_v35, %v1616_v46  ;;  %v1465_v39 = vadd.f32 %v1464_v14, %v3664_v40  ;;  %v1620_v46 = vmul.f32 %v3676_v59, %v3676_v59 }
 0x177   :  { %v1760_v60 = vadd.f32 %v1759_v62, %v1617_v12  ;;  %v1466_v4 = vadd.f32 %v3652_v18, %v1465_v39  ;;  %v1621_v62 = vmul.f32 %v3712_v22, %v3712_v22  ;;  %v4010_v12 = vpop.f32.mrf.mxu1  ;;  %v6015_v18 = vld [vmem:[#allocation99_spill] sm:$0xff] }
 0x178   :  { %5906 = vst [vmem:[#allocation101_spill] sm:$0xff] %v4010_v12 }
 0x179   :  { %v1467_v41 = vadd.f32 %v1466_v4, %v3688_v19  ;;  %v1761_v6 = vadd.f32 %v1760_v60, %v1618_v56  ;;  %v1622_v4 = vmul.f32 %v3700_v48, %v3700_v48 }
 0x17b   :  { %v1762_v14 = vadd.f32 %v1761_v6, %v1619_v25  ;;  %v1468_v35 = vadd.f32 %v3676_v59, %v1467_v41  ;;  %v1623_v25 = vmul.f32 %v3736_v27, %v3736_v27  ;;  %v4018_v6 = vpop.f32.mrf.mxu1 }
 0x17c   :  { %5907 = vst [vmem:[#allocation102_spill] sm:$0xff] %v4018_v6 }
 0x17d   :  { %v1469_v40 = vadd.f32 %v1468_v35, %v3712_v22  ;;  %v1763_v39 = vadd.f32 %v1762_v14, %v1620_v46  ;;  %v1624_v35 = vmul.f32 %v3724_v53, %v3724_v53 }
 0x17f   :  { %v1764_v56 = vadd.f32 %v1763_v39, %v1621_v62  ;;  %v1470_v60 = vadd.f32 %v3700_v48, %v1469_v40  ;;  %v1625_v62 = vmul.f32 %v3760_v5, %v3760_v5  ;;  %v4026_v39 = vpop.f32.mrf.mxu1  ;;  %v6016_v59 = vld [vmem:[#allocation101_spill] sm:$0xff] }
 0x180   :  { %5908 = vst [vmem:[#allocation103_spill] sm:$0xff] %v4026_v39 }
 0x181   :  { %v1471_v19 = vadd.f32 %v1470_v60, %v3736_v27  ;;  %v1765_v41 = vadd.f32 %v1764_v56, %v1622_v4  ;;  %v1626_v60 = vmul.f32 %v3748_v33, %v3748_v33 }
 0x183   :  { %v1766_v46 = vadd.f32 %v1765_v41, %v1623_v25  ;;  %v1472_v14 = vadd.f32 %v3724_v53, %v1471_v19  ;;  %v1627_v25 = vmul.f32 %v3784_v47, %v3784_v47  ;;  %v4034_v41 = vpop.f32.mrf.mxu1 }
 0x184   :  { %5909 = vst [vmem:[#allocation104_spill] sm:$0xff] %v4034_v41 }
 0x185   :  { %v1473_v22 = vadd.f32 %v1472_v14, %v3760_v5  ;;  %v1767_v40 = vadd.f32 %v1766_v46, %v1624_v35  ;;  %v1628_v14 = vmul.f32 %v3772_v36, %v3772_v36 }
 0x187   :  { %v1768_v4 = vadd.f32 %v1767_v40, %v1625_v62  ;;  %v1474_v56 = vadd.f32 %v3748_v33, %v1473_v22  ;;  %v1629_v62 = vmul.f32 %v3808_v28, %v3808_v28  ;;  %v4042_v40 = vpop.f32.mrf.mxu1  ;;  %v6012_v33 = vld [vmem:[#allocation94_spill] sm:$0xff]  ;;  %v6017_v48 = vld [vmem:[#allocation103_spill] sm:$0xff] }
 0x188   :  { %5910 = vst [vmem:[#allocation105_spill] sm:$0xff] %v4042_v40 }
 0x189   :  { %v1475_v27 = vadd.f32 %v1474_v56, %v3784_v47  ;;  %v1769_v19 = vadd.f32 %v1768_v4, %v1626_v60  ;;  %v1630_v56 = vmul.f32 %v3796_v15, %v3796_v15 }
 0x18b   :  { %v1770_v35 = vadd.f32 %v1769_v19, %v1627_v25  ;;  %v1476_v46 = vadd.f32 %v3772_v36, %v1475_v27  ;;  %v1631_v25 = vmul.f32 %v3832_v9, %v3832_v9  ;;  %v4050_v19 = vpop.f32.mrf.mxu1  ;;  %v6013_v36 = vld [vmem:[#allocation96_spill] sm:$0xff] }
 0x18c   :  { %5911 = vst [vmem:[#allocation106_spill] sm:$0xff] %v4050_v19 }
 0x18d   :  { %v1477_v5 = vadd.f32 %v1476_v46, %v3808_v28  ;;  %v1771_v22 = vadd.f32 %v1770_v35, %v1628_v14  ;;  %v1632_v46 = vmul.f32 %v3820_v0, %v3820_v0 }
 0x18f   :  { %v1772_v60 = vadd.f32 %v1771_v22, %v1629_v62  ;;  %v1478_v4 = vadd.f32 %v3796_v15, %v1477_v5  ;;  %v1633_v62 = vmul.f32 %v3856_v58, %v3856_v58  ;;  %v4058_v22 = vpop.f32.mrf.mxu1  ;;  %v6018_v13 = vld [vmem:[#allocation105_spill] sm:$0xff] }
 0x190   :  { %5912 = vst [vmem:[#allocation107_spill] sm:$0xff] %v4058_v22 }
 0x191   :  { %v1479_v47 = vadd.f32 %v1478_v4, %v3832_v9  ;;  %v1773_v27 = vadd.f32 %v1772_v60, %v1630_v56  ;;  %v1634_v4 = vmul.f32 %v3844_v49, %v3844_v49 }
 0x193   :  { %v1774_v14 = vadd.f32 %v1773_v27, %v1631_v25  ;;  %v1480_v35 = vadd.f32 %v3820_v0, %v1479_v47  ;;  %v1635_v25 = vmul.f32 %v3880_v44, %v3880_v44  ;;  %v4066_v27 = vpop.f32.mrf.mxu1 }
 0x194   :  { %5913 = vst [vmem:[#allocation108_spill] sm:$0xff] %v4066_v27 }
 0x195   :  { %v1481_v28 = vadd.f32 %v1480_v35, %v3856_v58  ;;  %v1775_v5 = vadd.f32 %v1774_v14, %v1632_v46  ;;  %v1636_v35 = vmul.f32 %v3868_v37, %v3868_v37 }
 0x197   :  { %v1776_v56 = vadd.f32 %v1775_v5, %v1633_v62  ;;  %v1482_v60 = vadd.f32 %v3844_v49, %v1481_v28  ;;  %v1637_v62 = vmul.f32 %v3904_v31, %v3904_v31  ;;  %v4074_v5 = vpop.f32.mrf.mxu1 }
 0x198   :  { %5914 = vst [vmem:[#allocation109_spill] sm:$0xff] %v4074_v5 }
 0x199   :  { %v1483_v9 = vadd.f32 %v1482_v60, %v3880_v44  ;;  %v1777_v47 = vadd.f32 %v1776_v56, %v1634_v4  ;;  %v1638_v60 = vmul.f32 %v3892_v24, %v3892_v24 }
 0x19b   :  { %v1778_v46 = vadd.f32 %v1777_v47, %v1635_v25  ;;  %v1484_v14 = vadd.f32 %v3868_v37, %v1483_v9  ;;  %v1639_v25 = vmul.f32 %v3928_v16, %v3928_v16  ;;  %v4082_v47 = vpop.f32.mrf.mxu1 }
 0x19c   :  { %5915 = vst [vmem:[#allocation110_spill] sm:$0xff] %v4082_v47 }
 0x19d   :  { %v1485_v58 = vadd.f32 %v1484_v14, %v3904_v31  ;;  %v1779_v28 = vadd.f32 %v1778_v46, %v1636_v35  ;;  %v1640_v14 = vmul.f32 %v3916_v11, %v3916_v11 }
 0x19f   :  { %v1780_v4 = vadd.f32 %v1779_v28, %v1637_v62  ;;  %v1486_v56 = vadd.f32 %v3892_v24, %v1485_v58  ;;  %v1641_v62 = vmul.f32 %v3946_v10, %v3946_v10  ;;  %v4090_v28 = vpop.f32.mrf.mxu1 }
 0x1a0   :  { %5916 = vst [vmem:[#allocation111_spill] sm:$0xff] %v4090_v28 }
 0x1a1   :  { %v1487_v44 = vadd.f32 %v1486_v56, %v3928_v16  ;;  %v1781_v9 = vadd.f32 %v1780_v4, %v1638_v60  ;;  %v1642_v56 = vmul.f32 %v3938_v63, %v3938_v63 }
 0x1a3   :  { %v1782_v35 = vadd.f32 %v1781_v9, %v1639_v25  ;;  %v1488_v46 = vadd.f32 %v3916_v11, %v1487_v44  ;;  %v1643_v25 = vmul.f32 %v3962_v8, %v3962_v8  ;;  %v4098_v9 = vpop.f32.mrf.mxu1 }
 0x1a4   :  { %5917 = vst [vmem:[#allocation112_spill] sm:$0xff] %v4098_v9 }
 0x1a5   :  { %v1489_v31 = vadd.f32 %v1488_v46, %v3946_v10  ;;  %v1783_v58 = vadd.f32 %v1782_v35, %v1640_v14  ;;  %v1644_v46 = vmul.f32 %v3954_v55, %v3954_v55 }
 0x1a7   :  { %v1784_v60 = vadd.f32 %v1783_v58, %v1641_v62  ;;  %v1490_v4 = vadd.f32 %v3938_v63, %v1489_v31  ;;  %v1645_v62 = vmul.f32 %v3978_v54, %v3978_v54  ;;  %v4106_v58 = vpop.f32.mrf.mxu1 }
 0x1a8   :  { %5918 = vst [vmem:[#allocation113_spill] sm:$0xff] %v4106_v58 }
 0x1a9   :  { %v1491_v24 = vadd.f32 %v1490_v4, %v3962_v8  ;;  %v1785_v44 = vadd.f32 %v1784_v60, %v1642_v56  ;;  %v1646_v4 = vmul.f32 %v3970_v45, %v3970_v45 }
 0x1ab   :  { %v1786_v14 = vadd.f32 %v1785_v44, %v1643_v25  ;;  %v1492_v35 = vadd.f32 %v3954_v55, %v1491_v24  ;;  %v1647_v25 = vmul.f32 %v3994_v1, %v3994_v1  ;;  %v4114_v44 = vpop.f32.mrf.mxu1 }
 0x1ac   :  { %5919 = vst [vmem:[#allocation114_spill] sm:$0xff] %v4114_v44 }
 0x1ad   :  { %v1493_v10 = vadd.f32 %v1492_v35, %v3978_v54  ;;  %v1787_v31 = vadd.f32 %v1786_v14, %v1644_v46  ;;  %v1648_v35 = vmul.f32 %v3986_v29, %v3986_v29 }
 0x1af   :  { %v1788_v56 = vadd.f32 %v1787_v31, %v1645_v62  ;;  %v1494_v60 = vadd.f32 %v3970_v45, %v1493_v10  ;;  %v1649_v62 = vmul.f32 %v4010_v12, %v4010_v12  ;;  %v4122_v31 = vpop.f32.mrf.mxu1 }
 0x1b0   :  { %5920 = vst [vmem:[#allocation115_spill] sm:$0xff] %v4122_v31 }
 0x1b1   :  { %v1495_v8 = vadd.f32 %v1494_v60, %v3994_v1  ;;  %v1789_v24 = vadd.f32 %v1788_v56, %v1646_v4  ;;  %v1650_v60 = vmul.f32 %v4002_v2, %v4002_v2 }
 0x1b3   :  { %v1790_v46 = vadd.f32 %v1789_v24, %v1647_v25  ;;  %v1496_v14 = vadd.f32 %v3986_v29, %v1495_v8  ;;  %v1651_v25 = vmul.f32 %v4026_v39, %v4026_v39  ;;  %v4130_v24 = vpop.f32.mrf.mxu1 }
 0x1b4   :  { %5921 = vst [vmem:[#allocation116_spill] sm:$0xff] %v4130_v24 }
 0x1b5   :  { %v1497_v54 = vadd.f32 %v1496_v14, %v4010_v12  ;;  %v1791_v10 = vadd.f32 %v1790_v46, %v1648_v35  ;;  %v1652_v14 = vmul.f32 %v4018_v6, %v4018_v6 }
 0x1b7   :  { %v1792_v4 = vadd.f32 %v1791_v10, %v1649_v62  ;;  %v1498_v56 = vadd.f32 %v4002_v2, %v1497_v54  ;;  %v1653_v62 = vmul.f32 %v4042_v40, %v4042_v40  ;;  %v4138_v10 = vpop.f32.mrf.mxu1 }
 0x1b8   :  { %5922 = vst [vmem:[#allocation117_spill] sm:$0xff] %v4138_v10 }
 0x1b9   :  { %v1499_v1 = vadd.f32 %v1498_v56, %v4026_v39  ;;  %v1793_v8 = vadd.f32 %v1792_v4, %v1650_v60  ;;  %v1654_v56 = vmul.f32 %v4034_v41, %v4034_v41 }
 0x1bb   :  { %v1794_v35 = vadd.f32 %v1793_v8, %v1651_v25  ;;  %v1500_v46 = vadd.f32 %v4018_v6, %v1499_v1  ;;  %v1655_v25 = vmul.f32 %v4058_v22, %v4058_v22  ;;  %v4146_v8 = vpop.f32.mrf.mxu1 }
 0x1bc   :  { %5923 = vst [vmem:[#allocation118_spill] sm:$0xff] %v4146_v8 }
 0x1bd   :  { %v1501_v12 = vadd.f32 %v1500_v46, %v4042_v40  ;;  %v1795_v54 = vadd.f32 %v1794_v35, %v1652_v14  ;;  %v1656_v46 = vmul.f32 %v4050_v19, %v4050_v19 }
 0x1bf   :  { %v1796_v60 = vadd.f32 %v1795_v54, %v1653_v62  ;;  %v1502_v4 = vadd.f32 %v4034_v41, %v1501_v12  ;;  %v1657_v62 = vmul.f32 %v4074_v5, %v4074_v5  ;;  %v4154_v54 = vpop.f32.mrf.mxu1 }
 0x1c0   :  { %5924 = vst [vmem:[#allocation119_spill] sm:$0xff] %v4154_v54 }
 0x1c1   :  { %v1503_v39 = vadd.f32 %v1502_v4, %v4058_v22  ;;  %v1797_v1 = vadd.f32 %v1796_v60, %v1654_v56  ;;  %v1658_v4 = vmul.f32 %v4066_v27, %v4066_v27 }
 0x1c3   :  { %v1798_v14 = vadd.f32 %v1797_v1, %v1655_v25  ;;  %v1504_v35 = vadd.f32 %v4050_v19, %v1503_v39  ;;  %v1659_v25 = vmul.f32 %v4090_v28, %v4090_v28  ;;  %v4162_v1 = vpop.f32.mrf.mxu1  ;;  %v6029_v41 = vld [vmem:[#allocation118_spill] sm:$0xff] }
 0x1c4   :  { %5925 = vst [vmem:[#allocation120_spill] sm:$0xff] %v4162_v1 }
 0x1c5   :  { %v1505_v40 = vadd.f32 %v1504_v35, %v4074_v5  ;;  %v1799_v12 = vadd.f32 %v1798_v14, %v1656_v46  ;;  %v1660_v35 = vmul.f32 %v4082_v47, %v4082_v47 }
 0x1c7   :  { %v1800_v56 = vadd.f32 %v1799_v12, %v1657_v62  ;;  %v1506_v60 = vadd.f32 %v4066_v27, %v1505_v40  ;;  %v1661_v62 = vmul.f32 %v4106_v58, %v4106_v58  ;;  %v4170_v12 = vpop.f32.mrf.mxu1 }
 0x1c8   :  { %5926 = vst [vmem:[#allocation121_spill] sm:$0xff] %v4170_v12 }
 0x1c9   :  { %v1507_v22 = vadd.f32 %v1506_v60, %v4090_v28  ;;  %v1801_v39 = vadd.f32 %v1800_v56, %v1658_v4  ;;  %v1662_v60 = vmul.f32 %v4098_v9, %v4098_v9 }
 0x1cb   :  { %v1802_v46 = vadd.f32 %v1801_v39, %v1659_v25  ;;  %v1508_v14 = vadd.f32 %v4082_v47, %v1507_v22  ;;  %v1663_v25 = vmul.f32 %v4122_v31, %v4122_v31  ;;  %v4178_v39 = vpop.f32.mrf.mxu1  ;;  %v6031_v19 = vld [vmem:[#allocation120_spill] sm:$0xff] }
 0x1cc   :  { %5927 = vst [vmem:[#allocation122_spill] sm:$0xff] %v4178_v39 }
 0x1cd   :  { %v1509_v5 = vadd.f32 %v1508_v14, %v4106_v58  ;;  %v1803_v40 = vadd.f32 %v1802_v46, %v1660_v35  ;;  %v1664_v14 = vmul.f32 %v4114_v44, %v4114_v44 }
 0x1cf   :  { %v1804_v4 = vadd.f32 %v1803_v40, %v1661_v62  ;;  %v1510_v56 = vadd.f32 %v4098_v9, %v1509_v5  ;;  %v1665_v62 = vmul.f32 %v4138_v10, %v4138_v10  ;;  %v4186_v40 = vpop.f32.mrf.mxu1  ;;  %v6030_v17 = vld [vmem:[#allocation121_spill] sm:$0xff] }
 0x1d0   :  { %5928 = vst [vmem:[#allocation123_spill] sm:$0xff] %v4186_v40 }
 0x1d1   :  { %v1511_v28 = vadd.f32 %v1510_v56, %v4122_v31  ;;  %v1805_v22 = vadd.f32 %v1804_v4, %v1662_v60  ;;  %v1666_v56 = vmul.f32 %v4130_v24, %v4130_v24 }
 0x1d3   :  { %v1806_v35 = vadd.f32 %v1805_v22, %v1663_v25  ;;  %v1512_v46 = vadd.f32 %v4114_v44, %v1511_v28  ;;  %v1667_v25 = vmul.f32 %v4154_v54, %v4154_v54  ;;  %v4194_v22 = vpop.f32.mrf.mxu1  ;;  %v6033_v27 = vld [vmem:[#allocation122_spill] sm:$0xff] }
 0x1d4   :  { %5929 = vst [vmem:[#allocation124_spill] sm:$0xff] %v4194_v22 }
 0x1d5   :  { %v1513_v58 = vadd.f32 %v1512_v46, %v4138_v10  ;;  %v1807_v5 = vadd.f32 %v1806_v35, %v1664_v14  ;;  %v1668_v46 = vmul.f32 %v4146_v8, %v4146_v8 }
 0x1d7   :  { %v1808_v60 = vadd.f32 %v1807_v5, %v1665_v62  ;;  %v1514_v4 = vadd.f32 %v4130_v24, %v1513_v58  ;;  %v1669_v62 = vmul.f32 %v4170_v12, %v4170_v12  ;;  %v4202_v5 = vpop.f32.mrf.mxu1  ;;  %v6032_v32 = vld [vmem:[#allocation123_spill] sm:$0xff] }
 0x1d8   :  { %5930 = vst [vmem:[#allocation125_spill] sm:$0xff] %v4202_v5 }
 0x1d9   :  { %v1515_v31 = vadd.f32 %v1514_v4, %v4154_v54  ;;  %v1809_v28 = vadd.f32 %v1808_v60, %v1666_v56  ;;  %v1670_v4 = vmul.f32 %v4162_v1, %v4162_v1 }
 0x1db   :  { %v1810_v14 = vadd.f32 %v1809_v28, %v1667_v25  ;;  %v1516_v35 = vadd.f32 %v4146_v8, %v1515_v31  ;;  %v1671_v25 = vmul.f32 %v4186_v40, %v4186_v40  ;;  %v4210_v28 = vpop.f32.mrf.mxu1  ;;  %v6035_v47 = vld [vmem:[#allocation124_spill] sm:$0xff] }
 0x1dd   :  { %v1517_v10 = vadd.f32 %v1516_v35, %v4170_v12  ;;  %v1811_v58 = vadd.f32 %v1810_v14, %v1668_v46  ;;  %v1672_v35 = vmul.f32 %v4178_v39, %v4178_v39 }
 0x1df   :  { %v1812_v56 = vadd.f32 %v1811_v58, %v1669_v62  ;;  %v1518_v60 = vadd.f32 %v4162_v1, %v1517_v10  ;;  %v1673_v62 = vmul.f32 %v4202_v5, %v4202_v5  ;;  %v4218_v58 = vpop.f32.mrf.mxu1 }
 0x1e1   :  { %v1519_v54 = vadd.f32 %v1518_v60, %v4186_v40  ;;  %v1813_v31 = vadd.f32 %v1812_v56, %v1670_v4  ;;  %v1674_v60 = vmul.f32 %v4194_v22, %v4194_v22 }
 0x1e3   :  { %v1814_v46 = vadd.f32 %v1813_v31, %v1671_v25  ;;  %v1520_v14 = vadd.f32 %v4178_v39, %v1519_v54  ;;  %v1675_v25 = vmul.f32 %v4218_v58, %v4218_v58  ;;  %v1676_v31 = vmul.f32 %v4210_v28, %v4210_v28 }
 0x1e5   :  { %v1521_v12 = vadd.f32 %v1520_v14, %v4202_v5  ;;  %v1815_v10 = vadd.f32 %v1814_v46, %v1672_v35 }
 0x1e7   :  { %v1816_v4 = vadd.f32 %v1815_v10, %v1673_v62  ;;  %v1522_v56 = vadd.f32 %v4194_v22, %v1521_v12 }
 0x1e9   :  { %v1523_v40 = vadd.f32 %v1522_v56, %v4218_v58  ;;  %v1817_v54 = vadd.f32 %v1816_v4, %v1674_v60 }
 0x1eb   :  { %v1524_v14 = vadd.f32 %v4210_v28, %v1523_v40  ;;  %v1818_v35 = vadd.f32 %v1817_v54, %v1675_v25 }
 0x1ed   :  { %v1525_v46 = vrot.slane %v1524_v14, 4  ;;  %v1819_v5 = vadd.f32 %v1818_v35, %v1676_v31  ;;  %v5935_v35 = vld [vmem:[#allocation10_spill] sm:$0xff] }
 0x1ee   :  { %v5982_v31 = vld [vmem:[#allocation78_spill] sm:$0xff] }
 0x1ef   :  { %v1526_v39 = vadd.f32 %v1525_v46, %v1524_v14  ;;  %v1820_v1 = vrot.slane %v1819_v5, 4  ;;  %v5934_v14 = vld [vmem:[#allocation12_spill] sm:$0xff] }
 0x1f1   :  { %v1527_v8 = vrot.slane %v1526_v39, 2  ;;  %v1821_v62 = vadd.f32 %v1820_v1, %v1819_v5  ;;  %v6004_v5 = vld [vmem:[#allocation54_spill] sm:$0xff] }
 0x1f3   :  { %v1528_v10 = vadd.f32 %v1527_v8, %v1526_v39  ;;  %v1822_v12 = vrot.slane %v1821_v62, 2  ;;  %v5989_v8 = vld [vmem:[#allocation91_spill] sm:$0xff] }
 0x1f5   :  { %v1529_v22 = vrot.slane %v1528_v10, 1  ;;  %v1823_v56 = vadd.f32 %v1822_v12, %v1821_v62  ;;  %v5931_v12 = vld [vmem:[#allocation5_spill] sm:$0xff] }
 0x1f7   :  { %v1530_v24 = vadd.f32 %v1529_v22, %v1528_v10  ;;  %v1824_v44 = vrot.slane %v1823_v56, 1  ;;  %v5984_v22 = vld [vmem:[#allocation80_spill] sm:$0xff] }
 0x1f9   :  { %v4229_v9 = vmul.f32 0.00086805556, %v1530_v24  ;;  %v1825_v60 = vadd.f32 %v1824_v44, %v1823_v56  ;;  %v6002_v44 = vld [vmem:[#allocation44_spill] sm:$0xff] }
 0x1fb   :  { %v1826_v4 = vmul.f32 0.00086805556, %v1825_v60  ;;  %v1827_v40 = vmul.f32 %v4229_v9, %v4229_v9  ;;  %v5932_v60 = vld [vmem:[#allocation9_spill] sm:$0xff]  ;;  %v5992_v56 = vsub.f32 %v3717_v43, %v4229_v9  ;;  %v5994_v54 = vsub.f32 %v3928_v16, %v4229_v9  ;;  %v5999_v43 = vld [vmem:[#allocation22_spill] sm:$0xff] }
 0x1fc   :  { %v5995_v46 = vsub.f32 %v4218_v58, %v4229_v9  ;;  %v5998_v58 = vld [vmem:[#allocation18_spill] sm:$0xff]  ;;  %v6036_v29 = vsub.f32 %v3511_v21, %v4229_v9  ;;  %v6037_v2 = vsub.f32 %v3509_v20, %v4229_v9  ;;  %v6038_v6 = vsub.f32 %v3521_v26, %v4229_v9 }
 0x1fd   :  { %v1828_v39 = vsub.f32 %v1826_v4, %v1827_v40  ;;  %v5933_v40 = vld [vmem:[#allocation7_spill] sm:$0xff]  ;;  %v5993_v4 = vsub.f32 %v3933_v57, %v4229_v9  ;;  %v6006_v57 = vld [vmem:[#allocation66_spill] sm:$0xff]  ;;  %v6039_v11 = vsub.f32 %v3515_v23, %v4229_v9 }
 0x1ff   :  { %v1973_v10 = vadd.f32 1e-05, %v1828_v39 }
 0x201   :  { %2879 = vrsqrt.f32 %v1973_v10  ;;  %v5986_v10 = vld [vmem:[#allocation83_spill] sm:$0xff] }
 0x20e   :  { %v4375_v39 = vpop.eup %2879 }
 0x20f   :  { %v2009_v24 = vmul.f32 %v4375_v39, %v5992_v56  ;;  %v2045_v1 = vmul.f32 %v4375_v39, %v5993_v4  ;;  %v2081_v25 = vmul.f32 %v4375_v39, %v5994_v54  ;;  %v2117_v62 = vmul.f32 %v4375_v39, %v5995_v46  ;;  %v5996_v56 = vld [vmem:[#allocation11_spill] sm:$0xff]  ;;  %v5997_v4 = vld [vmem:[#allocation14_spill] sm:$0xff]  ;;  %v6000_v54 = vld [vmem:[#allocation32_spill] sm:$0xff] }
 0x210   :  { %v6001_v46 = vld [vmem:[#allocation38_spill] sm:$0xff]  ;;  %v4543_v63 = vmul.f32 %v4375_v39, %v6036_v29  ;;  %v4549_v55 = vmul.f32 %v4375_v39, %v6037_v2  ;;  %v4561_v21 = vmul.f32 %v4375_v39, %v6039_v11  ;;  %v6040_v29 = vsub.f32 %v3531_v34, %v4229_v9 }
 0x211   :  { %v2153_v16 = vadd.f32 %v2045_v1, %v2009_v24  ;;  %v6041_v2 = vsub.f32 %v3526_v30, %v4229_v9  ;;  %v6045_v11 = vsub.f32 %v3536_v38, %v4229_v9 }
 0x212   :  { %v4567_v20 = vmul.f32 %v4375_v39, %v6040_v29  ;;  %v6047_v29 = vsub.f32 %v3551_v50, %v4229_v9 }
 0x213   :  { %v2189_v24 = vadd.f32 %v2153_v16, %v2081_v25  ;;  %v6003_v25 = vld [vmem:[#allocation48_spill] sm:$0xff]  ;;  %v4573_v26 = vmul.f32 %v4375_v39, %v6041_v2  ;;  %v4585_v34 = vmul.f32 %v4375_v39, %v6045_v11  ;;  %v6049_v2 = vsub.f32 %v5931_v12, %v4229_v9 }
 0x214   :  { %v6011_v16 = vld [vmem:[#allocation84_spill] sm:$0xff]  ;;  %v4591_v30 = vmul.f32 %v4375_v39, %v6047_v29  ;;  %v6053_v11 = vsub.f32 %v5933_v40, %v4229_v9  ;;  %v6055_v29 = vsub.f32 %v5934_v14, %v4229_v9 }
 0x215   :  { %v2225_v1 = vadd.f32 %v2189_v24, %v2117_v62  ;;  %v4555_v62 = vmul.f32 %v4375_v39, %v6038_v6  ;;  %6042 = vst [vmem:[#allocation5_spill] sm:$0xff] %v4573_v26  ;;  %v6043_v6 = vsub.f32 %v3541_v42, %v4229_v9  ;;  %6046 = vst [vmem:[#allocation7_spill] sm:$0xff] %v4585_v34 }
 0x216   :  { %6048 = vst [vmem:[#allocation12_spill] sm:$0xff] %v4591_v30  ;;  %v4597_v42 = vmul.f32 %v4375_v39, %v6049_v2  ;;  %v4609_v50 = vmul.f32 %v4375_v39, %v6053_v11  ;;  %v4615_v12 = vmul.f32 %v4375_v39, %v6055_v29  ;;  %v6057_v2 = vsub.f32 %v5935_v35, %v4229_v9  ;;  %v6062_v11 = vld [vmem:[#allocation13_spill] sm:$0xff]  ;;  %v6065_v29 = vld [vmem:[#allocation19_spill] sm:$0xff] }
 0x217   :  { %v2261_v24 = vmul.f32 0.25, %v2225_v1  ;;  %v6010_v1 = vld [vmem:[#allocation87_spill] sm:$0xff]  ;;  %v4579_v23 = vmul.f32 %v4375_v39, %v6043_v6  ;;  %v6051_v6 = vsub.f32 %v5932_v60, %v4229_v9 }
 0x218   :  { %6050 = vst [vmem:[#allocation10_spill] sm:$0xff] %v4597_v42  ;;  %6054 = vst [vmem:[#allocation80_spill] sm:$0xff] %v4609_v50  ;;  %v4621_v60 = vmul.f32 %v4375_v39, %v6057_v2  ;;  %v6063_v50 = vsub.f32 %v6062_v11, %v4229_v9  ;;  %v6068_v2 = vld [vmem:[#allocation17_spill] sm:$0xff] }
 0x219   :  { %v2297_v15 = vmax.f32 %v2261_v24, 0.0  ;;  %v6014_v24 = vld [vmem:[#allocation97_spill] sm:$0xff]  ;;  %6044 = vst [vmem:[#allocation9_spill] sm:$0xff] %v4579_v23  ;;  %v4603_v38 = vmul.f32 %v4375_v39, %v6051_v6  ;;  %6056 = vst [vmem:[#allocation83_spill] sm:$0xff] %v4615_v12  ;;  %v6059_v6 = vld [vmem:[#allocation15_spill] sm:$0xff]  ;;  %v6066_v12 = vsub.f32 %v6065_v29, %v4229_v9 }
 0x21a   :  { %6058 = vst [vmem:[#allocation91_spill] sm:$0xff] %v4621_v60  ;;  %v4633_v14 = vmul.f32 %v4375_v39, %v6063_v50  ;;  %v6069_v60 = vsub.f32 %v6068_v2, %v4229_v9  ;;  %v6074_v50 = vld [vmem:[#allocation21_spill] sm:$0xff] }
 0x21b   :  { %2333 = vst [vmem:[#allocation2 + $0x110] sm:$0xff] %v2297_v15  ;;  %v6034_v15 = vld [vmem:[#allocation125_spill] sm:$0xff]  ;;  %6052 = vst [vmem:[#allocation78_spill] sm:$0xff] %v4603_v38  ;;  %v6060_v38 = vsub.f32 %v6059_v6, %v4229_v9  ;;  %v4639_v35 = vmul.f32 %v4375_v39, %v6066_v12 }
 0x21c   :  { %6064 = vst [vmem:[#allocation14_spill] sm:$0xff] %v4633_v14  ;;  %v4645_v6 = vmul.f32 %v4375_v39, %v6069_v60  ;;  %v6075_v14 = vsub.f32 %v6074_v50, %v4229_v9  ;;  %v6077_v12 = vld [vmem:[#allocation25_spill] sm:$0xff]  ;;  %v6080_v60 = vld [vmem:[#allocation24_spill] sm:$0xff] }
 0x21d   :  { %v4627_v40 = vmul.f32 %v4375_v39, %v6060_v38  ;;  %6067 = vst [vmem:[#allocation18_spill] sm:$0xff] %v4639_v35  ;;  %v6071_v38 = vld [vmem:[#allocation23_spill] sm:$0xff]  ;;  %v6078_v35 = vsub.f32 %v6077_v12, %v4229_v9 }
 0x21e   :  { %6070 = vst [vmem:[#allocation22_spill] sm:$0xff] %v4645_v6  ;;  %v4657_v29 = vmul.f32 %v4375_v39, %v6075_v14  ;;  %v6081_v6 = vsub.f32 %v6080_v60, %v4229_v9  ;;  %v6086_v14 = vld [vmem:[#allocation26_spill] sm:$0xff] }
 0x21f   :  { %6061 = vst [vmem:[#allocation11_spill] sm:$0xff] %v4627_v40  ;;  %v6072_v40 = vsub.f32 %v6071_v38, %v4229_v9  ;;  %v4663_v2 = vmul.f32 %v4375_v39, %v6078_v35  ;;  %v6089_v35 = vld [vmem:[#allocation30_spill] sm:$0xff] }
 0x220   :  { %6076 = vst [vmem:[#allocation38_spill] sm:$0xff] %v4657_v29  ;;  %v4669_v38 = vmul.f32 %v4375_v39, %v6081_v6  ;;  %v6087_v29 = vsub.f32 %v6086_v14, %v4229_v9  ;;  %v6092_v6 = vld [vmem:[#allocation28_spill] sm:$0xff] }
 0x221   :  { %v4651_v11 = vmul.f32 %v4375_v39, %v6072_v40  ;;  %6079 = vst [vmem:[#allocation44_spill] sm:$0xff] %v4663_v2  ;;  %v6083_v40 = vld [vmem:[#allocation27_spill] sm:$0xff]  ;;  %v6090_v2 = vsub.f32 %v6089_v35, %v4229_v9 }
 0x222   :  { %6082 = vst [vmem:[#allocation48_spill] sm:$0xff] %v4669_v38  ;;  %v4681_v12 = vmul.f32 %v4375_v39, %v6087_v29  ;;  %v6093_v38 = vsub.f32 %v6092_v6, %v4229_v9  ;;  %v6098_v29 = vld [vmem:[#allocation31_spill] sm:$0xff] }
 0x223   :  { %6073 = vst [vmem:[#allocation32_spill] sm:$0xff] %v4651_v11  ;;  %v6084_v11 = vsub.f32 %v6083_v40, %v4229_v9  ;;  %v4687_v60 = vmul.f32 %v4375_v39, %v6090_v2  ;;  %v6101_v2 = vld [vmem:[#allocation36_spill] sm:$0xff] }
 0x224   :  { %6088 = vst [vmem:[#allocation60_spill] sm:$0xff] %v4681_v12  ;;  %v4693_v40 = vmul.f32 %v4375_v39, %v6093_v38  ;;  %v6099_v12 = vsub.f32 %v6098_v29, %v4229_v9  ;;  %v6104_v38 = vld [vmem:[#allocation34_spill] sm:$0xff] }
 0x225   :  { %v4675_v50 = vmul.f32 %v4375_v39, %v6084_v11  ;;  %6091 = vst [vmem:[#allocation66_spill] sm:$0xff] %v4687_v60  ;;  %v6095_v11 = vld [vmem:[#allocation33_spill] sm:$0xff]  ;;  %v6102_v60 = vsub.f32 %v6101_v2, %v4229_v9 }
 0x226   :  { %6094 = vst [vmem:[#allocation87_spill] sm:$0xff] %v4693_v40  ;;  %v4705_v35 = vmul.f32 %v4375_v39, %v6099_v12  ;;  %v6105_v40 = vsub.f32 %v6104_v38, %v4229_v9  ;;  %v6110_v12 = vld [vmem:[#allocation37_spill] sm:$0xff] }
 0x227   :  { %6085 = vst [vmem:[#allocation54_spill] sm:$0xff] %v4675_v50  ;;  %v6096_v50 = vsub.f32 %v6095_v11, %v4229_v9  ;;  %v4711_v6 = vmul.f32 %v4375_v39, %v6102_v60  ;;  %v6113_v60 = vld [vmem:[#allocation42_spill] sm:$0xff] }
 0x228   :  { %6100 = vst [vmem:[#allocation94_spill] sm:$0xff] %v4705_v35  ;;  %v4717_v11 = vmul.f32 %v4375_v39, %v6105_v40  ;;  %v6111_v35 = vsub.f32 %v6110_v12, %v4229_v9  ;;  %v6116_v40 = vld [vmem:[#allocation40_spill] sm:$0xff] }
 0x229   :  { %v4699_v14 = vmul.f32 %v4375_v39, %v6096_v50  ;;  %6103 = vst [vmem:[#allocation96_spill] sm:$0xff] %v4711_v6  ;;  %v6107_v50 = vld [vmem:[#allocation39_spill] sm:$0xff]  ;;  %v6114_v6 = vsub.f32 %v6113_v60, %v4229_v9 }
 0x22a   :  { %6106 = vst [vmem:[#allocation97_spill] sm:$0xff] %v4717_v11  ;;  %v4729_v2 = vmul.f32 %v4375_v39, %v6111_v35  ;;  %v6117_v11 = vsub.f32 %v6116_v40, %v4229_v9  ;;  %v6122_v35 = vld [vmem:[#allocation46_spill] sm:$0xff] }
 0x22b   :  { %6097 = vst [vmem:[#allocation84_spill] sm:$0xff] %v4699_v14  ;;  %v6108_v14 = vsub.f32 %v6107_v50, %v4229_v9  ;;  %v4735_v38 = vmul.f32 %v4375_v39, %v6114_v6  ;;  %v6124_v6 = vld [vmem:[#allocation45_spill] sm:$0xff] }
 0x22c   :  { %6112 = vst [vmem:[#allocation101_spill] sm:$0xff] %v4729_v2  ;;  %v4741_v50 = vmul.f32 %v4375_v39, %v6117_v11  ;;  %v6123_v2 = vsub.f32 %v6122_v35, %v4229_v9  ;;  %v6126_v11 = vld [vmem:[#allocation49_spill] sm:$0xff] }
 0x22d   :  { %v4723_v29 = vmul.f32 %v4375_v39, %v6108_v14  ;;  %6115 = vst [vmem:[#allocation103_spill] sm:$0xff] %v4735_v38  ;;  %v6119_v14 = vld [vmem:[#allocation43_spill] sm:$0xff]  ;;  %v6125_v38 = vsub.f32 %v6124_v6, %v4229_v9 }
 0x22e   :  { %6118 = vst [vmem:[#allocation105_spill] sm:$0xff] %v4741_v50  ;;  %v4753_v60 = vmul.f32 %v4375_v39, %v6123_v2  ;;  %v6127_v50 = vsub.f32 %v6126_v11, %v4229_v9  ;;  %v6130_v2 = vld [vmem:[#allocation52_spill] sm:$0xff] }
 0x22f   :  { %6109 = vst [vmem:[#allocation99_spill] sm:$0xff] %v4723_v29  ;;  %v6120_v29 = vsub.f32 %v6119_v14, %v4229_v9  ;;  %v4759_v40 = vmul.f32 %v4375_v39, %v6125_v38  ;;  %v6131_v42 = vsub.f32 %v6130_v2, %v4229_v9  ;;  %v6132_v38 = vld [vmem:[#allocation50_spill] sm:$0xff] }
 0x230   :  { %v4765_v14 = vmul.f32 %v4375_v39, %v6127_v50  ;;  %v6133_v30 = vsub.f32 %v6132_v38, %v4229_v9  ;;  %v6135_v50 = vld [vmem:[#allocation55_spill] sm:$0xff] }
 0x231   :  { %v4747_v12 = vmul.f32 %v4375_v39, %v6120_v29  ;;  %v6128_v29 = vld [vmem:[#allocation47_spill] sm:$0xff]  ;;  %v4777_v6 = vmul.f32 %v4375_v39, %v6131_v42  ;;  %v6136_v34 = vsub.f32 %v6135_v50, %v4229_v9  ;;  %v6141_v42 = vld [vmem:[#allocation58_spill] sm:$0xff] }
 0x232   :  { %v4783_v11 = vmul.f32 %v4375_v39, %v6133_v30  ;;  %v6142_v26 = vsub.f32 %v6141_v42, %v4229_v9  ;;  %v6144_v30 = vld [vmem:[#allocation56_spill] sm:$0xff] }
 0x233   :  { %6121 = vst [vmem:[#allocation118_spill] sm:$0xff] %v4747_v12  ;;  %v6129_v12 = vsub.f32 %v6128_v29, %v4229_v9  ;;  %v4789_v29 = vmul.f32 %v4375_v39, %v6136_v34  ;;  %v6147_v34 = vld [vmem:[#allocation61_spill] sm:$0xff] }
 0x234   :  { %6134 = vst [vmem:[#allocation121_spill] sm:$0xff] %v4783_v11  ;;  %v4801_v38 = vmul.f32 %v4375_v39, %v6142_v26  ;;  %v6145_v11 = vsub.f32 %v6144_v30, %v4229_v9  ;;  %v6153_v26 = vld [vmem:[#allocation64_spill] sm:$0xff] }
 0x235   :  { %v4771_v35 = vmul.f32 %v4375_v39, %v6129_v12  ;;  %6137 = vst [vmem:[#allocation120_spill] sm:$0xff] %v4789_v29  ;;  %v6138_v12 = vld [vmem:[#allocation53_spill] sm:$0xff]  ;;  %v6148_v29 = vsub.f32 %v6147_v34, %v4229_v9 }
 0x236   :  { %v6139_v23 = vsub.f32 %v6138_v12, %v4229_v9  ;;  %6143 = vst [vmem:[#allocation122_spill] sm:$0xff] %v4801_v38  ;;  %v4807_v50 = vmul.f32 %v4375_v39, %v6145_v11  ;;  %v6154_v38 = vsub.f32 %v6153_v26, %v4229_v9  ;;  %v6156_v11 = vld [vmem:[#allocation62_spill] sm:$0xff] }
 0x237   :  { %v4813_v12 = vmul.f32 %v4375_v39, %v6148_v29  ;;  %v6159_v29 = vld [vmem:[#allocation67_spill] sm:$0xff] }
 0x238   :  { %v4795_v2 = vmul.f32 %v4375_v39, %v6139_v23  ;;  %6146 = vst [vmem:[#allocation125_spill] sm:$0xff] %v4807_v50  ;;  %v6150_v23 = vld [vmem:[#allocation59_spill] sm:$0xff]  ;;  %v4825_v30 = vmul.f32 %v4375_v39, %v6154_v38  ;;  %v6157_v50 = vsub.f32 %v6156_v11, %v4229_v9  ;;  %v6165_v38 = vld [vmem:[#allocation69_spill] sm:$0xff] }
 0x239   :  { %6149 = vst [vmem:[#allocation124_spill] sm:$0xff] %v4813_v12  ;;  %v6160_v12 = vsub.f32 %v6159_v29, %v4229_v9 }
 0x23a   :  { %6140 = vst [vmem:[#allocation123_spill] sm:$0xff] %v4795_v2  ;;  %v6151_v2 = vsub.f32 %v6150_v23, %v4229_v9  ;;  %6155 = vst [vmem:[#allocation13_spill] sm:$0xff] %v4825_v30  ;;  %v4831_v34 = vmul.f32 %v4375_v39, %v6157_v50  ;;  %v6166_v30 = vsub.f32 %v6165_v38, %v4229_v9  ;;  %v6168_v50 = vld [vmem:[#allocation68_spill] sm:$0xff] }
 0x23b   :  { %v4837_v23 = vmul.f32 %v4375_v39, %v6160_v12  ;;  %v6171_v12 = vld [vmem:[#allocation72_spill] sm:$0xff] }
 0x23c   :  { %v4819_v42 = vmul.f32 %v4375_v39, %v6151_v2  ;;  %6158 = vst [vmem:[#allocation19_spill] sm:$0xff] %v4831_v34  ;;  %v6162_v2 = vld [vmem:[#allocation65_spill] sm:$0xff]  ;;  %v4849_v11 = vmul.f32 %v4375_v39, %v6166_v30  ;;  %v6169_v34 = vsub.f32 %v6168_v50, %v4229_v9  ;;  %v6177_v30 = vld [vmem:[#allocation74_spill] sm:$0xff] }
 0x23d   :  { %6161 = vst [vmem:[#allocation17_spill] sm:$0xff] %v4837_v23  ;;  %v6172_v23 = vsub.f32 %v6171_v12, %v4229_v9 }
 0x23e   :  { %6152 = vst [vmem:[#allocation15_spill] sm:$0xff] %v4819_v42  ;;  %v6163_v42 = vsub.f32 %v6162_v2, %v4229_v9  ;;  %6167 = vst [vmem:[#allocation21_spill] sm:$0xff] %v4849_v11  ;;  %v4855_v29 = vmul.f32 %v4375_v39, %v6169_v34  ;;  %v6178_v11 = vsub.f32 %v6177_v30, %v4229_v9  ;;  %v6180_v34 = vld [vmem:[#allocation73_spill] sm:$0xff] }
 0x23f   :  { %v4861_v2 = vmul.f32 %v4375_v39, %v6172_v23  ;;  %v6182_v23 = vld [vmem:[#allocation77_spill] sm:$0xff] }
 0x240   :  { %v4843_v26 = vmul.f32 %v4375_v39, %v6163_v42  ;;  %6170 = vst [vmem:[#allocation25_spill] sm:$0xff] %v4855_v29  ;;  %v6174_v42 = vld [vmem:[#allocation70_spill] sm:$0xff]  ;;  %v4873_v50 = vmul.f32 %v4375_v39, %v6178_v11  ;;  %v6181_v29 = vsub.f32 %v6180_v34, %v4229_v9  ;;  %v6187_v11 = vld [vmem:[#allocation79_spill] sm:$0xff] }
 0x241   :  { %6173 = vst [vmem:[#allocation24_spill] sm:$0xff] %v4861_v2  ;;  %v6183_v2 = vsub.f32 %v6182_v23, %v4229_v9 }
 0x242   :  { %6164 = vst [vmem:[#allocation23_spill] sm:$0xff] %v4843_v26  ;;  %v6175_v26 = vsub.f32 %v6174_v42, %v4229_v9  ;;  %6179 = vst [vmem:[#allocation26_spill] sm:$0xff] %v4873_v50  ;;  %v4879_v12 = vmul.f32 %v4375_v39, %v6181_v29  ;;  %v6188_v50 = vsub.f32 %v6187_v11, %v4229_v9 }
 0x243   :  { %v4885_v42 = vmul.f32 %v4375_v39, %v6183_v2  ;;  %v6190_v29 = vsub.f32 %v5982_v31, %v4229_v9  ;;  %v6191_v2 = vld [vmem:[#allocation82_spill] sm:$0xff] }
 0x244   :  { %v4867_v38 = vmul.f32 %v4375_v39, %v6175_v26  ;;  %v6185_v26 = vld [vmem:[#allocation75_spill] sm:$0xff]  ;;  %v4897_v34 = vmul.f32 %v4375_v39, %v6188_v50  ;;  %v6196_v50 = vld [vmem:[#allocation85_spill] sm:$0xff] }
 0x245   :  { %6184 = vst [vmem:[#allocation30_spill] sm:$0xff] %v4885_v42  ;;  %v4903_v23 = vmul.f32 %v4375_v39, %v6190_v29  ;;  %v6192_v42 = vsub.f32 %v6191_v2, %v4229_v9  ;;  %v6198_v29 = vsub.f32 %v5986_v10, %v4229_v9 }
 0x246   :  { %6176 = vst [vmem:[#allocation27_spill] sm:$0xff] %v4867_v38  ;;  %v6186_v38 = vsub.f32 %v6185_v26, %v4229_v9  ;;  %6189 = vst [vmem:[#allocation28_spill] sm:$0xff] %v4897_v34  ;;  %v6197_v34 = vsub.f32 %v6196_v50, %v4229_v9 }
 0x247   :  { %v4909_v26 = vmul.f32 %v4375_v39, %v6192_v42  ;;  %v4927_v2 = vmul.f32 %v4375_v39, %v6198_v29  ;;  %v6200_v42 = vld [vmem:[#allocation88_spill] sm:$0xff]  ;;  %v6208_v29 = vld [vmem:[#allocation89_spill] sm:$0xff] }
 0x248   :  { %v4891_v30 = vmul.f32 %v4375_v39, %v6186_v38  ;;  %v6194_v38 = vsub.f32 %v5984_v22, %v4229_v9  ;;  %v4921_v31 = vmul.f32 %v4375_v39, %v6197_v34  ;;  %v6206_v34 = vsub.f32 %v5989_v8, %v4229_v9 }
 0x249   :  { %6193 = vst [vmem:[#allocation33_spill] sm:$0xff] %v4909_v26  ;;  %6199 = vst [vmem:[#allocation36_spill] sm:$0xff] %v4927_v2  ;;  %v6201_v26 = vsub.f32 %v6200_v42, %v4229_v9  ;;  %v6209_v2 = vsub.f32 %v6208_v29, %v4229_v9 }
 0x24a   :  { %v4915_v11 = vmul.f32 %v4375_v39, %v6194_v38  ;;  %v6203_v38 = vld [vmem:[#allocation86_spill] sm:$0xff]  ;;  %v4945_v10 = vmul.f32 %v4375_v39, %v6206_v34 }
 0x24b   :  { %v4933_v22 = vmul.f32 %v4375_v39, %v6201_v26  ;;  %v4951_v42 = vmul.f32 %v4375_v39, %v6209_v2  ;;  %v6210_v26 = vld [vmem:[#allocation92_spill] sm:$0xff]  ;;  %v6214_v34 = vld [vmem:[#allocation6_spill] sm:$0xff]  ;;  %v6216_v2 = vsub.f32 %v5996_v56, %v4229_v9 }
 0x24c   :  { %6195 = vst [vmem:[#allocation31_spill] sm:$0xff] %v4915_v11  ;;  %v6204_v11 = vsub.f32 %v6203_v38, %v4229_v9  ;;  %6207 = vst [vmem:[#allocation37_spill] sm:$0xff] %v4945_v10  ;;  %v6215_v10 = vsub.f32 %v6214_v34, %v4229_v9 }
 0x24d   :  { %6202 = vst [vmem:[#allocation34_spill] sm:$0xff] %v4933_v22  ;;  %v6211_v22 = vsub.f32 %v6210_v26, %v4229_v9  ;;  %v4975_v26 = vmul.f32 %v4375_v39, %v6216_v2  ;;  %v6222_v2 = vsub.f32 %v5998_v58, %v4229_v9 }
 0x24e   :  { %v4939_v50 = vmul.f32 %v4375_v39, %v6204_v11  ;;  %v6212_v11 = vld [vmem:[#allocation8_spill] sm:$0xff]  ;;  %v4969_v29 = vmul.f32 %v4375_v39, %v6215_v10  ;;  %v6220_v10 = vsub.f32 %v3581_v7, %v4229_v9 }
 0x24f   :  { %v4957_v38 = vmul.f32 %v4375_v39, %v6211_v22  ;;  %v6217_v22 = vsub.f32 %v3567_v61, %v4229_v9  ;;  %v4999_v61 = vmul.f32 %v4375_v39, %v6222_v2  ;;  %v6229_v2 = vsub.f32 %v3640_v3, %v4229_v9 }
 0x250   :  { %6205 = vst [vmem:[#allocation39_spill] sm:$0xff] %v4939_v50  ;;  %v6213_v50 = vsub.f32 %v6212_v11, %v4229_v9  ;;  %v4993_v56 = vmul.f32 %v4375_v39, %v6220_v10  ;;  %v6226_v10 = vld [vmem:[#allocation20_spill] sm:$0xff] }
 0x251   :  { %v4981_v11 = vmul.f32 %v4375_v39, %v6217_v22  ;;  %v6223_v22 = vld [vmem:[#allocation16_spill] sm:$0xff] }
 0x252   :  { %v4963_v8 = vmul.f32 %v4375_v39, %v6213_v50  ;;  %v6219_v50 = vsub.f32 %v5997_v4, %v4229_v9  ;;  %6221 = vst [vmem:[#allocation40_spill] sm:$0xff] %v4993_v56  ;;  %v6227_v56 = vsub.f32 %v6226_v10, %v4229_v9 }
 0x253   :  { %6218 = vst [vmem:[#allocation42_spill] sm:$0xff] %v4981_v11  ;;  %v6224_v11 = vsub.f32 %v6223_v22, %v4229_v9  ;;  %v5023_v22 = vmul.f32 %v4375_v39, %v6229_v2  ;;  %v6236_v2 = vsub.f32 %v6001_v46, %v4229_v9 }
 0x254   :  { %v4987_v34 = vmul.f32 %v4375_v39, %v6219_v50  ;;  %v6225_v50 = vsub.f32 %v5999_v43, %v4229_v9  ;;  %v5017_v58 = vmul.f32 %v4375_v39, %v6227_v56  ;;  %v6233_v56 = vld [vmem:[#allocation29_spill] sm:$0xff] }
 0x255   :  { %v5005_v4 = vmul.f32 %v4375_v39, %v6224_v11  ;;  %v6230_v11 = vsub.f32 %v3628_v52, %v4229_v9  ;;  %v5047_v52 = vmul.f32 %v4375_v39, %v6236_v2  ;;  %v6243_v2 = vsub.f32 %v6003_v25, %v4229_v9 }
 0x256   :  { %v5011_v7 = vmul.f32 %v4375_v39, %v6225_v50  ;;  %6228 = vst [vmem:[#allocation43_spill] sm:$0xff] %v5017_v58  ;;  %v6232_v50 = vsub.f32 %v6000_v54, %v4229_v9  ;;  %v6234_v58 = vsub.f32 %v6233_v56, %v4229_v9 }
 0x257   :  { %v5029_v43 = vmul.f32 %v4375_v39, %v6230_v11  ;;  %v6237_v11 = vld [vmem:[#allocation35_spill] sm:$0xff] }
 0x258   :  { %v5035_v10 = vmul.f32 %v4375_v39, %v6232_v50  ;;  %v5041_v3 = vmul.f32 %v4375_v39, %v6234_v58  ;;  %v6239_v50 = vsub.f32 %v6002_v44, %v4229_v9  ;;  %v6240_v58 = vld [vmem:[#allocation41_spill] sm:$0xff] }
 0x259   :  { %6231 = vst [vmem:[#allocation46_spill] sm:$0xff] %v5029_v43  ;;  %v6238_v43 = vsub.f32 %v6237_v11, %v4229_v9  ;;  %v5071_v11 = vmul.f32 %v4375_v39, %v6243_v2  ;;  %v6250_v2 = vsub.f32 %v6005_v51, %v4229_v9 }
 0x25a   :  { %6235 = vst [vmem:[#allocation45_spill] sm:$0xff] %v5041_v3  ;;  %v5059_v56 = vmul.f32 %v4375_v39, %v6239_v50  ;;  %v6241_v3 = vsub.f32 %v6240_v58, %v4229_v9  ;;  %v6246_v50 = vsub.f32 %v6004_v5, %v4229_v9 }
 0x25b   :  { %v5053_v54 = vmul.f32 %v4375_v39, %v6238_v43  ;;  %v6244_v43 = vsub.f32 %v3724_v53, %v4229_v9  ;;  %v5095_v53 = vmul.f32 %v4375_v39, %v6250_v2  ;;  %v6260_v2 = vld [vmem:[#allocation71_spill] sm:$0xff] }
 0x25c   :  { %v5065_v46 = vmul.f32 %v4375_v39, %v6241_v3  ;;  %v5083_v58 = vmul.f32 %v4375_v39, %v6246_v50  ;;  %v6247_v3 = vld [vmem:[#allocation51_spill] sm:$0xff]  ;;  %v6255_v50 = vsub.f32 %v6006_v57, %v4229_v9 }
 0x25d   :  { %v5077_v44 = vmul.f32 %v4375_v39, %v6244_v43  ;;  %6251 = vst [vmem:[#allocation50_spill] sm:$0xff] %v5095_v53  ;;  %v6252_v43 = vld [vmem:[#allocation57_spill] sm:$0xff]  ;;  %v6261_v53 = vsub.f32 %v6260_v2, %v4229_v9 }
 0x25e   :  { %6242 = vst [vmem:[#allocation49_spill] sm:$0xff] %v5065_v46  ;;  %v6248_v46 = vsub.f32 %v6247_v3, %v4229_v9  ;;  %v5107_v3 = vmul.f32 %v4375_v39, %v6255_v50  ;;  %v6265_v50 = vld [vmem:[#allocation76_spill] sm:$0xff] }
 0x25f   :  { %6245 = vst [vmem:[#allocation47_spill] sm:$0xff] %v5077_v44  ;;  %v6253_v44 = vsub.f32 %v6252_v43, %v4229_v9  ;;  %v5119_v43 = vmul.f32 %v4375_v39, %v6261_v53  ;;  %v6270_v53 = vld [vmem:[#allocation81_spill] sm:$0xff] }
 0x260   :  { %v5089_v25 = vmul.f32 %v4375_v39, %v6248_v46  ;;  %6256 = vst [vmem:[#allocation53_spill] sm:$0xff] %v5107_v3  ;;  %v6257_v46 = vld [vmem:[#allocation63_spill] sm:$0xff]  ;;  %v6266_v3 = vsub.f32 %v6265_v50, %v4229_v9 }
 0x261   :  { %v5101_v5 = vmul.f32 %v4375_v39, %v6253_v44  ;;  %6262 = vst [vmem:[#allocation56_spill] sm:$0xff] %v5119_v43  ;;  %v6263_v44 = vsub.f32 %v3820_v0, %v4229_v9  ;;  %v6271_v43 = vsub.f32 %v6270_v53, %v4229_v9 }
 0x262   :  { %6249 = vst [vmem:[#allocation52_spill] sm:$0xff] %v5089_v25  ;;  %v6258_v25 = vsub.f32 %v6257_v46, %v4229_v9  ;;  %v5131_v46 = vmul.f32 %v4375_v39, %v6266_v3  ;;  %v6275_v3 = vsub.f32 %v6010_v1, %v4229_v9 }
 0x263   :  { %6254 = vst [vmem:[#allocation55_spill] sm:$0xff] %v5101_v5  ;;  %v5125_v57 = vmul.f32 %v4375_v39, %v6263_v44  ;;  %v5143_v0 = vmul.f32 %v4375_v39, %v6271_v43  ;;  %v6273_v44 = vsub.f32 %v3868_v37, %v4229_v9  ;;  %v6279_v43 = vld [vmem:[#allocation90_spill] sm:$0xff]  ;;  %v6423_v5 = vld [vmem:[#allocation105_spill] sm:$0xff] }
 0x264   :  { %v5113_v51 = vmul.f32 %v4375_v39, %v6258_v25  ;;  %6267 = vst [vmem:[#allocation59_spill] sm:$0xff] %v5131_v46  ;;  %v6268_v25 = vsub.f32 %v3844_v49, %v4229_v9  ;;  %v5155_v49 = vmul.f32 %v4375_v39, %v6275_v3  ;;  %v6284_v3 = vld [vmem:[#allocation93_spill] sm:$0xff]  ;;  %v6417_v46 = vld [vmem:[#allocation99_spill] sm:$0xff] }
 0x265   :  { %6264 = vst [vmem:[#allocation61_spill] sm:$0xff] %v5125_v57  ;;  %6272 = vst [vmem:[#allocation62_spill] sm:$0xff] %v5143_v0  ;;  %v5149_v50 = vmul.f32 %v4375_v39, %v6273_v44  ;;  %v6280_v0 = vsub.f32 %v6279_v43, %v4229_v9  ;;  %v6282_v44 = vsub.f32 %v6012_v33, %v4229_v9  ;;  %v6419_v57 = vld [vmem:[#allocation101_spill] sm:$0xff] }
 0x266   :  { %6259 = vst [vmem:[#allocation58_spill] sm:$0xff] %v5113_v51  ;;  %v5137_v2 = vmul.f32 %v4375_v39, %v6268_v25  ;;  %6276 = vst [vmem:[#allocation65_spill] sm:$0xff] %v5155_v49  ;;  %v6277_v25 = vsub.f32 %v6011_v16, %v4229_v9  ;;  %v6285_v49 = vsub.f32 %v6284_v3, %v4229_v9  ;;  %v6421_v51 = vld [vmem:[#allocation103_spill] sm:$0xff] }
 0x267   :  { %6274 = vst [vmem:[#allocation67_spill] sm:$0xff] %v5149_v50  ;;  %v5167_v37 = vmul.f32 %v4375_v39, %v6280_v0  ;;  %v5173_v1 = vmul.f32 %v4375_v39, %v6282_v44  ;;  %v6289_v0 = vld [vmem:[#allocation95_spill] sm:$0xff]  ;;  %v6292_v44 = vsub.f32 %v6014_v24, %v4229_v9  ;;  %v6412_v50 = vld [vmem:[#allocation94_spill] sm:$0xff] }
 0x268   :  { %6269 = vst [vmem:[#allocation64_spill] sm:$0xff] %v5137_v2  ;;  %v5161_v53 = vmul.f32 %v4375_v39, %v6277_v25  ;;  %v5179_v16 = vmul.f32 %v4375_v39, %v6285_v49  ;;  %v6287_v25 = vsub.f32 %v6013_v36, %v4229_v9  ;;  %v6294_v49 = vsub.f32 %v3970_v45, %v4229_v9  ;;  %v6414_v2 = vld [vmem:[#allocation96_spill] sm:$0xff] }
 0x269   :  { %6281 = vst [vmem:[#allocation68_spill] sm:$0xff] %v5167_v37  ;;  %6283 = vst [vmem:[#allocation72_spill] sm:$0xff] %v5173_v1  ;;  %v6290_v37 = vsub.f32 %v6289_v0, %v4229_v9  ;;  %v5197_v3 = vmul.f32 %v4375_v39, %v6292_v44  ;;  %v6301_v44 = vsub.f32 %v6016_v59, %v4229_v9  ;;  %v6406_v1 = vld [vmem:[#allocation60_spill] sm:$0xff] }
 0x26a   :  { %6278 = vst [vmem:[#allocation69_spill] sm:$0xff] %v5161_v53  ;;  %6286 = vst [vmem:[#allocation70_spill] sm:$0xff] %v5179_v16  ;;  %v5185_v43 = vmul.f32 %v4375_v39, %v6287_v25  ;;  %v5203_v36 = vmul.f32 %v4375_v39, %v6294_v49  ;;  %v6296_v25 = vsub.f32 %v6015_v18, %v4229_v9  ;;  %v6303_v49 = vld [vmem:[#allocation100_spill] sm:$0xff]  ;;  %v6409_v53 = vld [vmem:[#allocation87_spill] sm:$0xff] }
 0x26b   :  { %v5191_v33 = vmul.f32 %v4375_v39, %v6290_v37  ;;  %6293 = vst [vmem:[#allocation77_spill] sm:$0xff] %v5197_v3  ;;  %v6298_v37 = vld [vmem:[#allocation98_spill] sm:$0xff]  ;;  %v5221_v45 = vmul.f32 %v4375_v39, %v6301_v44  ;;  %v6311_v44 = vsub.f32 %v6018_v13, %v4229_v9  ;;  %v6403_v16 = vld [vmem:[#allocation48_spill] sm:$0xff] }
 0x26c   :  { %6288 = vst [vmem:[#allocation74_spill] sm:$0xff] %v5185_v43  ;;  %6295 = vst [vmem:[#allocation75_spill] sm:$0xff] %v5203_v36  ;;  %v5209_v0 = vmul.f32 %v4375_v39, %v6296_v25  ;;  %v6304_v36 = vsub.f32 %v6303_v49, %v4229_v9  ;;  %v6306_v25 = vsub.f32 %v6017_v48, %v4229_v9  ;;  %v6399_v3 = vld [vmem:[#allocation38_spill] sm:$0xff]  ;;  %v6401_v43 = vld [vmem:[#allocation44_spill] sm:$0xff] }
 0x26d   :  { %6291 = vst [vmem:[#allocation73_spill] sm:$0xff] %v5191_v33  ;;  %v6299_v33 = vsub.f32 %v6298_v37, %v4229_v9  ;;  %6302 = vst [vmem:[#allocation85_spill] sm:$0xff] %v5221_v45  ;;  %v5245_v49 = vmul.f32 %v4375_v39, %v6311_v44  ;;  %v6322_v44 = vld [vmem:[#allocation109_spill] sm:$0xff]  ;;  %v6395_v45 = vld [vmem:[#allocation22_spill] sm:$0xff] }
 0x26e   :  { %6297 = vst [vmem:[#allocation79_spill] sm:$0xff] %v5209_v0  ;;  %v5227_v18 = vmul.f32 %v4375_v39, %v6304_v36  ;;  %v5233_v37 = vmul.f32 %v4375_v39, %v6306_v25  ;;  %v6313_v36 = vld [vmem:[#allocation104_spill] sm:$0xff]  ;;  %v6316_v25 = vld [vmem:[#allocation107_spill] sm:$0xff] }
 0x26f   :  { %v5215_v24 = vmul.f32 %v4375_v39, %v6299_v33  ;;  %v6308_v33 = vld [vmem:[#allocation102_spill] sm:$0xff]  ;;  %6312 = vst [vmem:[#allocation92_spill] sm:$0xff] %v5245_v49  ;;  %v6323_v49 = vsub.f32 %v6322_v44, %v4229_v9  ;;  %v6397_v0 = vld [vmem:[#allocation32_spill] sm:$0xff] }
 0x270   :  { %6305 = vst [vmem:[#allocation88_spill] sm:$0xff] %v5227_v18  ;;  %6307 = vst [vmem:[#allocation86_spill] sm:$0xff] %v5233_v37  ;;  %v6314_v18 = vsub.f32 %v6313_v36, %v4229_v9  ;;  %v6317_v37 = vsub.f32 %v6316_v25, %v4229_v9 }
 0x271   :  { %6300 = vst [vmem:[#allocation82_spill] sm:$0xff] %v5215_v24  ;;  %v6309_v24 = vsub.f32 %v6308_v33, %v4229_v9  ;;  %v5269_v36 = vmul.f32 %v4375_v39, %v6323_v49  ;;  %v6334_v49 = vld [vmem:[#allocation113_spill] sm:$0xff] }
 0x272   :  { %v5251_v48 = vmul.f32 %v4375_v39, %v6314_v18  ;;  %v5257_v33 = vmul.f32 %v4375_v39, %v6317_v37  ;;  %v6325_v18 = vld [vmem:[#allocation108_spill] sm:$0xff]  ;;  %v6328_v37 = vld [vmem:[#allocation111_spill] sm:$0xff] }
 0x273   :  { %v5239_v59 = vmul.f32 %v4375_v39, %v6309_v24  ;;  %v6319_v24 = vld [vmem:[#allocation106_spill] sm:$0xff]  ;;  %6324 = vst [vmem:[#allocation20_spill] sm:$0xff] %v5269_v36  ;;  %v6335_v36 = vsub.f32 %v6334_v49, %v4229_v9 }
 0x274   :  { %6315 = vst [vmem:[#allocation8_spill] sm:$0xff] %v5251_v48  ;;  %6318 = vst [vmem:[#allocation6_spill] sm:$0xff] %v5257_v33  ;;  %v6326_v48 = vsub.f32 %v6325_v18, %v4229_v9  ;;  %v6329_v33 = vsub.f32 %v6328_v37, %v4229_v9 }
 0x275   :  { %6310 = vst [vmem:[#allocation89_spill] sm:$0xff] %v5239_v59  ;;  %v6320_v59 = vsub.f32 %v6319_v24, %v4229_v9  ;;  %v5293_v18 = vmul.f32 %v4375_v39, %v6335_v36  ;;  %v6346_v36 = vld [vmem:[#allocation117_spill] sm:$0xff] }
 0x276   :  { %v5275_v25 = vmul.f32 %v4375_v39, %v6326_v48  ;;  %v5281_v24 = vmul.f32 %v4375_v39, %v6329_v33  ;;  %v6337_v48 = vld [vmem:[#allocation112_spill] sm:$0xff]  ;;  %v6340_v33 = vld [vmem:[#allocation115_spill] sm:$0xff] }
 0x277   :  { %v5263_v13 = vmul.f32 %v4375_v39, %v6320_v59  ;;  %v6331_v59 = vld [vmem:[#allocation110_spill] sm:$0xff]  ;;  %6336 = vst [vmem:[#allocation51_spill] sm:$0xff] %v5293_v18  ;;  %v6347_v18 = vsub.f32 %v6346_v36, %v4229_v9 }
 0x278   :  { %6327 = vst [vmem:[#allocation29_spill] sm:$0xff] %v5275_v25  ;;  %6330 = vst [vmem:[#allocation35_spill] sm:$0xff] %v5281_v24  ;;  %v6338_v25 = vsub.f32 %v6337_v48, %v4229_v9  ;;  %v6341_v24 = vsub.f32 %v6340_v33, %v4229_v9 }
 0x279   :  { %6321 = vst [vmem:[#allocation16_spill] sm:$0xff] %v5263_v13  ;;  %v6332_v13 = vsub.f32 %v6331_v59, %v4229_v9  ;;  %v5317_v48 = vmul.f32 %v4375_v39, %v6347_v18  ;;  %v6357_v18 = vsub.f32 %v6030_v17, %v4229_v9 }
 0x27a   :  { %v5299_v37 = vmul.f32 %v4375_v39, %v6338_v25  ;;  %v5305_v59 = vmul.f32 %v4375_v39, %v6341_v24  ;;  %v6349_v25 = vld [vmem:[#allocation116_spill] sm:$0xff]  ;;  %v6352_v24 = vld [vmem:[#allocation119_spill] sm:$0xff] }
 0x27b   :  { %v5287_v44 = vmul.f32 %v4375_v39, %v6332_v13  ;;  %v6343_v13 = vld [vmem:[#allocation114_spill] sm:$0xff]  ;;  %6348 = vst [vmem:[#allocation76_spill] sm:$0xff] %v5317_v48 }
 0x27c   :  { %6339 = vst [vmem:[#allocation57_spill] sm:$0xff] %v5299_v37  ;;  %6342 = vst [vmem:[#allocation63_spill] sm:$0xff] %v5305_v59  ;;  %v6350_v37 = vsub.f32 %v6349_v25, %v4229_v9  ;;  %v6353_v59 = vsub.f32 %v6352_v24, %v4229_v9  ;;  %v5341_v25 = vmul.f32 %v4375_v39, %v6357_v18  ;;  %v6391_v48 = vld [vmem:[#allocation14_spill] sm:$0xff] }
 0x27d   :  { %6333 = vst [vmem:[#allocation41_spill] sm:$0xff] %v5287_v44  ;;  %v6344_v44 = vsub.f32 %v6343_v13, %v4229_v9  ;;  %v6365_v18 = vsub.f32 %v6034_v15, %v4229_v9  ;;  %v2120_v15 = vadd.f32 %v4759_v40, %v4549_v55  ;;  %v6378_v55 = vld [vmem:[#allocation122_spill] sm:$0xff] }
 0x27e   :  { %v5323_v33 = vmul.f32 %v4375_v39, %v6350_v37  ;;  %v5329_v13 = vmul.f32 %v4375_v39, %v6353_v59  ;;  %6358 = vst [vmem:[#allocation95_spill] sm:$0xff] %v5341_v25  ;;  %v6359_v37 = vsub.f32 %v6031_v19, %v4229_v9  ;;  %v6361_v59 = vsub.f32 %v6032_v32, %v4229_v9  ;;  %v6383_v25 = vld [vmem:[#allocation80_spill] sm:$0xff] }
 0x27f   :  { %v5311_v49 = vmul.f32 %v4375_v39, %v6344_v44  ;;  %v6355_v44 = vsub.f32 %v6029_v41, %v4229_v9  ;;  %v5365_v19 = vmul.f32 %v4375_v39, %v6365_v18  ;;  %v2121_v18 = vadd.f32 %v4765_v14, %v4555_v62  ;;  %v6380_v62 = vld [vmem:[#allocation125_spill] sm:$0xff] }
 0x280   :  { %6351 = vst [vmem:[#allocation81_spill] sm:$0xff] %v5323_v33  ;;  %6354 = vst [vmem:[#allocation90_spill] sm:$0xff] %v5329_v13  ;;  %v5347_v24 = vmul.f32 %v4375_v39, %v6359_v37  ;;  %v5353_v41 = vmul.f32 %v4375_v39, %v6361_v59  ;;  %v6367_v37 = vsub.f32 %v6035_v47, %v4229_v9  ;;  %v6387_v13 = vld [vmem:[#allocation91_spill] sm:$0xff] }
 0x281   :  { %6345 = vst [vmem:[#allocation71_spill] sm:$0xff] %v5311_v49  ;;  %v5335_v36 = vmul.f32 %v4375_v39, %v6355_v44  ;;  %v6363_v44 = vsub.f32 %v6033_v27, %v4229_v9  ;;  %6366 = vst [vmem:[#allocation104_spill] sm:$0xff] %v5365_v19  ;;  %v6369_v59 = vsub.f32 %v4210_v28, %v4229_v9  ;;  %v6372_v9 = vld [vmem:[#allocation121_spill] sm:$0xff]  ;;  %v6375_v19 = vld [vmem:[#allocation7_spill] sm:$0xff] }
 0x282   :  { %6360 = vst [vmem:[#allocation98_spill] sm:$0xff] %v5347_v24  ;;  %6362 = vst [vmem:[#allocation100_spill] sm:$0xff] %v5353_v41  ;;  %v5371_v32 = vmul.f32 %v4375_v39, %v6367_v37  ;;  %v2122_v47 = vadd.f32 %v4771_v35, %v4561_v21  ;;  %v2123_v37 = vadd.f32 %v4777_v6, %v4567_v20  ;;  %v6379_v41 = vld [vmem:[#allocation10_spill] sm:$0xff]  ;;  %v6382_v21 = vld [vmem:[#allocation124_spill] sm:$0xff] }
 0x283   :  { %6356 = vst [vmem:[#allocation93_spill] sm:$0xff] %v5335_v36  ;;  %v5359_v17 = vmul.f32 %v4375_v39, %v6363_v44  ;;  %v5377_v27 = vmul.f32 %v4375_v39, %v6369_v59  ;;  %v2119_v44 = vadd.f32 %v4753_v60, %v4543_v63  ;;  %v6373_v39 = vld [vmem:[#allocation9_spill] sm:$0xff]  ;;  %v6374_v59 = vld [vmem:[#allocation120_spill] sm:$0xff]  ;;  %v6376_v63 = vld [vmem:[#allocation123_spill] sm:$0xff]  ;;  %v2128_v14 = vadd.f32 %v6380_v62, %v6379_v41 }
 0x284   :  { %6368 = vst [vmem:[#allocation107_spill] sm:$0xff] %v5371_v32  ;;  %v6371_v32 = vld [vmem:[#allocation5_spill] sm:$0xff]  ;;  %v2126_v60 = vadd.f32 %v6376_v63, %v6375_v19  ;;  %v6381_v24 = vld [vmem:[#allocation78_spill] sm:$0xff]  ;;  %v6384_v20 = vld [vmem:[#allocation15_spill] sm:$0xff] }
 0x285   :  { %6364 = vst [vmem:[#allocation102_spill] sm:$0xff] %v5359_v17  ;;  %6370 = vst [vmem:[#allocation106_spill] sm:$0xff] %v5377_v27  ;;  %v2124_v28 = vadd.f32 %v6372_v9, %v6371_v32  ;;  %v2125_v27 = vadd.f32 %v6374_v59, %v6373_v39  ;;  %v6377_v17 = vld [vmem:[#allocation12_spill] sm:$0xff]  ;;  %v2129_v35 = vadd.f32 %v6382_v21, %v6381_v24  ;;  %v6385_v36 = vld [vmem:[#allocation83_spill] sm:$0xff] }
 0x286   :  { %v2127_v40 = vadd.f32 %v6378_v55, %v6377_v17  ;;  %v2130_v6 = vadd.f32 %v6384_v20, %v6383_v25  ;;  %v6386_v32 = vld [vmem:[#allocation13_spill] sm:$0xff]  ;;  %v6388_v39 = vld [vmem:[#allocation19_spill] sm:$0xff]  ;;  %v6393_v49 = vld [vmem:[#allocation18_spill] sm:$0xff] }
 0x287   :  { %v2131_v9 = vadd.f32 %v6386_v32, %v6385_v36  ;;  %v2132_v59 = vadd.f32 %v6388_v39, %v6387_v13  ;;  %v6389_v33 = vld [vmem:[#allocation11_spill] sm:$0xff]  ;;  %v6390_v19 = vld [vmem:[#allocation17_spill] sm:$0xff]  ;;  %v6398_v25 = vld [vmem:[#allocation24_spill] sm:$0xff] }
 0x288   :  { %v2133_v63 = vadd.f32 %v6390_v19, %v6389_v33  ;;  %v6392_v17 = vld [vmem:[#allocation23_spill] sm:$0xff]  ;;  %v6394_v41 = vld [vmem:[#allocation21_spill] sm:$0xff]  ;;  %v2137_v20 = vadd.f32 %v6398_v25, %v6397_v0  ;;  %v6402_v13 = vld [vmem:[#allocation26_spill] sm:$0xff]  ;;  %v2140_v33 = vadd.f32 %v4879_v12, %v6403_v16  ;;  %v2144_v0 = vadd.f32 %v4903_v23, %v6409_v53 }
 0x289   :  { %v2134_v55 = vadd.f32 %v6392_v17, %v6391_v48  ;;  %v2135_v62 = vadd.f32 %v6394_v41, %v6393_v49  ;;  %v6396_v24 = vld [vmem:[#allocation25_spill] sm:$0xff]  ;;  %v6400_v36 = vld [vmem:[#allocation27_spill] sm:$0xff]  ;;  %v2139_v39 = vadd.f32 %v6402_v13, %v6401_v43  ;;  %v6404_v19 = vld [vmem:[#allocation54_spill] sm:$0xff]  ;;  %v2142_v49 = vadd.f32 %v4891_v30, %v6406_v1 }
 0x28a   :  { %v2136_v21 = vadd.f32 %v6396_v24, %v6395_v45  ;;  %v2138_v32 = vadd.f32 %v6400_v36, %v6399_v3  ;;  %v6405_v48 = vld [vmem:[#allocation30_spill] sm:$0xff]  ;;  %v6408_v45 = vld [vmem:[#allocation28_spill] sm:$0xff]  ;;  %v6411_v3 = vld [vmem:[#allocation33_spill] sm:$0xff]  ;;  %v2147_v12 = vadd.f32 %v4921_v31, %v6414_v2  ;;  %v2155_v31 = vadd.f32 %v2119_v44, %v4963_v8 }
 0x28b   :  { %v2141_v17 = vadd.f32 %v6405_v48, %v6404_v19  ;;  %v6407_v41 = vld [vmem:[#allocation66_spill] sm:$0xff]  ;;  %v6410_v25 = vld [vmem:[#allocation84_spill] sm:$0xff]  ;;  %v6413_v43 = vld [vmem:[#allocation31_spill] sm:$0xff]  ;;  %v2156_v2 = vadd.f32 %v2120_v15, %v4969_v29  ;;  %v2165_v8 = vadd.f32 %v2129_v35, %v5023_v22  ;;  %v2175_v22 = vadd.f32 %v2139_v39, %v5083_v58 }
 0x28c   :  { %v2143_v24 = vadd.f32 %v6408_v45, %v6407_v41  ;;  %v2145_v36 = vadd.f32 %v6411_v3, %v6410_v25  ;;  %v2146_v13 = vadd.f32 %v6413_v43, %v6412_v50  ;;  %v6415_v16 = vld [vmem:[#allocation97_spill] sm:$0xff]  ;;  %v6416_v19 = vld [vmem:[#allocation36_spill] sm:$0xff]  ;;  %v6418_v30 = vld [vmem:[#allocation34_spill] sm:$0xff]  ;;  %v2152_v25 = vadd.f32 %v4951_v42, %v6423_v5 }
 0x28d   :  { %v2148_v48 = vadd.f32 %v6416_v19, %v6415_v16  ;;  %v2149_v1 = vadd.f32 %v6418_v30, %v6417_v46  ;;  %v6420_v41 = vld [vmem:[#allocation39_spill] sm:$0xff]  ;;  %v6422_v23 = vld [vmem:[#allocation37_spill] sm:$0xff]  ;;  %v6424_v3 = vld [vmem:[#allocation118_spill] sm:$0xff]  ;;  %v2157_v43 = vadd.f32 %v2121_v18, %v4975_v26  ;;  %v2159_v19 = vadd.f32 %v2123_v37, %v4987_v34 }
 0x28e   :  { %v2150_v45 = vadd.f32 %v6420_v41, %v6419_v57  ;;  %v2151_v53 = vadd.f32 %v6422_v23, %v6421_v51  ;;  %v2154_v50 = vadd.f32 %v4957_v38, %v6424_v3  ;;  %v6425_v16 = vld [vmem:[#allocation42_spill] sm:$0xff]  ;;  %v6426_v57 = vld [vmem:[#allocation40_spill] sm:$0xff]  ;;  %v2161_v51 = vadd.f32 %v2125_v27, %v4999_v61  ;;  %v6427_v5 = vld [vmem:[#allocation43_spill] sm:$0xff] }
 0x28f   :  { %v2158_v46 = vadd.f32 %v2122_v47, %v6425_v16  ;;  %v2160_v30 = vadd.f32 %v2124_v28, %v6426_v57  ;;  %v2162_v41 = vadd.f32 %v2126_v60, %v5005_v4  ;;  %v2163_v42 = vadd.f32 %v2127_v40, %v5011_v7  ;;  %v6428_v44 = vld [vmem:[#allocation46_spill] sm:$0xff]  ;;  %v6429_v15 = vld [vmem:[#allocation45_spill] sm:$0xff]  ;;  %v6431_v37 = vld [vmem:[#allocation47_spill] sm:$0xff] }
 0x290   :  { %v2164_v38 = vadd.f32 %v2128_v14, %v6427_v5  ;;  %v2166_v29 = vadd.f32 %v2130_v6, %v6428_v44  ;;  %v2167_v26 = vadd.f32 %v2131_v9, %v5035_v10  ;;  %v2168_v18 = vadd.f32 %v2132_v59, %v6429_v15  ;;  %v6430_v27 = vld [vmem:[#allocation49_spill] sm:$0xff]  ;;  %v6432_v60 = vld [vmem:[#allocation52_spill] sm:$0xff]  ;;  %v6433_v14 = vld [vmem:[#allocation50_spill] sm:$0xff] }
 0x291   :  { %v2169_v34 = vadd.f32 %v2133_v63, %v5047_v52  ;;  %v2170_v47 = vadd.f32 %v2134_v55, %v5053_v54  ;;  %v2171_v61 = vadd.f32 %v2135_v62, %v5059_v56  ;;  %v2172_v4 = vadd.f32 %v2136_v21, %v6430_v27  ;;  %v6434_v35 = vld [vmem:[#allocation55_spill] sm:$0xff]  ;;  %v6435_v9 = vld [vmem:[#allocation53_spill] sm:$0xff]  ;;  %v6436_v59 = vld [vmem:[#allocation58_spill] sm:$0xff] }
 0x292   :  { %v2173_v7 = vadd.f32 %v2137_v20, %v5071_v11  ;;  %v2174_v28 = vadd.f32 %v2138_v32, %v6431_v37  ;;  %v2176_v40 = vadd.f32 %v2140_v33, %v6432_v60  ;;  %v2177_v10 = vadd.f32 %v2141_v17, %v6433_v14  ;;  %v6437_v63 = vld [vmem:[#allocation56_spill] sm:$0xff]  ;;  %v6438_v55 = vld [vmem:[#allocation61_spill] sm:$0xff]  ;;  %v6439_v21 = vld [vmem:[#allocation59_spill] sm:$0xff] }
 0x293   :  { %v2178_v6 = vadd.f32 %v2142_v49, %v6434_v35  ;;  %v2179_v52 = vadd.f32 %v2143_v24, %v6435_v9  ;;  %v2180_v54 = vadd.f32 %v2144_v0, %v6436_v59  ;;  %v2181_v56 = vadd.f32 %v2145_v36, %v6437_v63  ;;  %v6440_v20 = vld [vmem:[#allocation64_spill] sm:$0xff]  ;;  %v6441_v23 = vld [vmem:[#allocation62_spill] sm:$0xff]  ;;  %v6442_v39 = vld [vmem:[#allocation67_spill] sm:$0xff] }
 0x294   :  { %v2182_v62 = vadd.f32 %v2146_v13, %v6438_v55  ;;  %v2183_v11 = vadd.f32 %v2147_v12, %v6439_v21  ;;  %v2184_v32 = vadd.f32 %v2148_v48, %v6440_v20  ;;  %v2185_v58 = vadd.f32 %v2149_v1, %v6441_v23  ;;  %v6443_v3 = vld [vmem:[#allocation65_spill] sm:$0xff]  ;;  %v6445_v57 = vld [vmem:[#allocation68_spill] sm:$0xff]  ;;  %v6447_v44 = vld [vmem:[#allocation70_spill] sm:$0xff] }
 0x295   :  { %v2186_v33 = vadd.f32 %v2150_v45, %v6442_v39  ;;  %v2187_v17 = vadd.f32 %v2151_v53, %v6443_v3  ;;  %v6444_v16 = vld [vmem:[#allocation69_spill] sm:$0xff]  ;;  %v2190_v24 = vadd.f32 %v2154_v50, %v6445_v57  ;;  %v6446_v5 = vld [vmem:[#allocation72_spill] sm:$0xff]  ;;  %v2192_v36 = vadd.f32 %v2156_v2, %v6447_v44  ;;  %v6448_v15 = vld [vmem:[#allocation74_spill] sm:$0xff] }
 0x296   :  { %v2188_v49 = vadd.f32 %v2152_v25, %v6444_v16  ;;  %v2191_v0 = vadd.f32 %v2155_v31, %v6446_v5  ;;  %v2193_v13 = vadd.f32 %v2157_v43, %v6448_v15  ;;  %v6449_v27 = vld [vmem:[#allocation73_spill] sm:$0xff]  ;;  %v6451_v60 = vld [vmem:[#allocation75_spill] sm:$0xff]  ;;  %v6453_v35 = vld [vmem:[#allocation82_spill] sm:$0xff] }
 0x297   :  { %v2194_v12 = vadd.f32 %v2158_v46, %v6449_v27  ;;  %v6450_v37 = vld [vmem:[#allocation77_spill] sm:$0xff]  ;;  %v2196_v1 = vadd.f32 %v2160_v30, %v6451_v60  ;;  %v6452_v14 = vld [vmem:[#allocation79_spill] sm:$0xff]  ;;  %v2198_v53 = vadd.f32 %v2162_v41, %v6453_v35  ;;  %v6455_v59 = vld [vmem:[#allocation88_spill] sm:$0xff] }
 0x298   :  { %v2195_v48 = vadd.f32 %v2159_v19, %v6450_v37  ;;  %v2197_v45 = vadd.f32 %v2161_v51, %v6452_v14  ;;  %v6454_v9 = vld [vmem:[#allocation85_spill] sm:$0xff]  ;;  %v2200_v50 = vadd.f32 %v2164_v38, %v6455_v59  ;;  %v6456_v63 = vld [vmem:[#allocation86_spill] sm:$0xff]  ;;  %v6458_v21 = vld [vmem:[#allocation92_spill] sm:$0xff] }
 0x299   :  { %v2199_v25 = vadd.f32 %v2163_v42, %v6454_v9  ;;  %v2201_v31 = vadd.f32 %v2165_v8, %v6456_v63  ;;  %v6457_v55 = vld [vmem:[#allocation89_spill] sm:$0xff]  ;;  %v2203_v43 = vadd.f32 %v2167_v26, %v6458_v21  ;;  %v6459_v20 = vld [vmem:[#allocation8_spill] sm:$0xff]  ;;  %v6460_v23 = vld [vmem:[#allocation6_spill] sm:$0xff] }
 0x29a   :  { %v2202_v2 = vadd.f32 %v2166_v29, %v6457_v55  ;;  %v2204_v46 = vadd.f32 %v2168_v18, %v6459_v20  ;;  %v2205_v19 = vadd.f32 %v2169_v34, %v6460_v23  ;;  %v6461_v39 = vld [vmem:[#allocation16_spill] sm:$0xff]  ;;  %v6463_v16 = vld [vmem:[#allocation29_spill] sm:$0xff]  ;;  %v6464_v57 = vld [vmem:[#allocation35_spill] sm:$0xff] }
 0x29b   :  { %v2206_v30 = vadd.f32 %v2170_v47, %v6461_v39  ;;  %v6462_v3 = vld [vmem:[#allocation20_spill] sm:$0xff]  ;;  %v2208_v41 = vadd.f32 %v2172_v4, %v6463_v16  ;;  %v2209_v42 = vadd.f32 %v2173_v7, %v6464_v57  ;;  %v6465_v5 = vld [vmem:[#allocation41_spill] sm:$0xff]  ;;  %v6466_v44 = vld [vmem:[#allocation51_spill] sm:$0xff]  ;;  %v2229_v16 = vmul.f32 0.25, %v2193_v13 }
 0x29c   :  { %v2207_v51 = vadd.f32 %v2171_v61, %v6462_v3  ;;  %v2210_v38 = vadd.f32 %v2174_v28, %v6465_v5  ;;  %v2211_v8 = vadd.f32 %v2175_v22, %v6466_v44  ;;  %v6467_v15 = vld [vmem:[#allocation57_spill] sm:$0xff]  ;;  %v6468_v27 = vld [vmem:[#allocation63_spill] sm:$0xff]  ;;  %v6470_v60 = vld [vmem:[#allocation76_spill] sm:$0xff]  ;;  %v2227_v3 = vmul.f32 0.25, %v2191_v0 }
 0x29d   :  { %v2212_v29 = vadd.f32 %v2176_v40, %v6467_v15  ;;  %v2213_v26 = vadd.f32 %v2177_v10, %v6468_v27  ;;  %v6469_v37 = vld [vmem:[#allocation71_spill] sm:$0xff]  ;;  %v2215_v34 = vadd.f32 %v2179_v52, %v6470_v60  ;;  %v6471_v14 = vld [vmem:[#allocation81_spill] sm:$0xff]  ;;  %v6472_v35 = vld [vmem:[#allocation90_spill] sm:$0xff]  ;;  %v2231_v57 = vmul.f32 0.25, %v2195_v48 }
 0x29e   :  { %v2214_v18 = vadd.f32 %v2178_v6, %v6469_v37  ;;  %v2216_v47 = vadd.f32 %v2180_v54, %v6471_v14  ;;  %v2217_v61 = vadd.f32 %v2181_v56, %v6472_v35  ;;  %v6473_v9 = vld [vmem:[#allocation93_spill] sm:$0xff]  ;;  %v6474_v59 = vld [vmem:[#allocation95_spill] sm:$0xff]  ;;  %v6475_v63 = vld [vmem:[#allocation98_spill] sm:$0xff]  ;;  %v2228_v54 = vmul.f32 0.25, %v2192_v36 }
 0x29f   :  { %v2218_v4 = vadd.f32 %v2182_v62, %v6473_v9  ;;  %v2219_v7 = vadd.f32 %v2183_v11, %v6474_v59  ;;  %v2220_v28 = vadd.f32 %v2184_v32, %v6475_v63  ;;  %v6476_v55 = vld [vmem:[#allocation100_spill] sm:$0xff]  ;;  %v6477_v21 = vld [vmem:[#allocation102_spill] sm:$0xff]  ;;  %v6479_v23 = vld [vmem:[#allocation107_spill] sm:$0xff]  ;;  %v2230_v56 = vmul.f32 0.25, %v2194_v12 }
 0x2a0   :  { %v2221_v22 = vadd.f32 %v2185_v58, %v6476_v55  ;;  %v2222_v40 = vadd.f32 %v2186_v33, %v6477_v21  ;;  %v6478_v20 = vld [vmem:[#allocation104_spill] sm:$0xff]  ;;  %v2224_v6 = vadd.f32 %v2188_v49, %v6479_v23  ;;  %v6480_v39 = vld [vmem:[#allocation106_spill] sm:$0xff]  ;;  %v2232_v62 = vmul.f32 0.25, %v2196_v1 }
 0x2a1   :  { %v2223_v10 = vadd.f32 %v2187_v17, %v6478_v20  ;;  %v2226_v52 = vadd.f32 %v2190_v24, %v6480_v39  ;;  %v2233_v5 = vmul.f32 0.25, %v2197_v45  ;;  %v2234_v11 = vmul.f32 0.25, %v2198_v53 }
 0x2a2   :  { %v2235_v44 = vmul.f32 0.25, %v2199_v25  ;;  %v2236_v32 = vmul.f32 0.25, %v2200_v50  ;;  %v2237_v15 = vmul.f32 0.25, %v2201_v31  ;;  %v2238_v58 = vmul.f32 0.25, %v2202_v2 }
 0x2a3   :  { %v2239_v27 = vmul.f32 0.25, %v2203_v43  ;;  %v2240_v33 = vmul.f32 0.25, %v2204_v46  ;;  %v5519_v37 = vmul.f32 0.25, %v2205_v19  ;;  %v5521_v17 = vmul.f32 0.25, %v2206_v30 }
 0x2a4   :  { %v5523_v49 = vmul.f32 0.25, %v2207_v51  ;;  %v5525_v24 = vmul.f32 0.25, %v2208_v41  ;;  %v5527_v0 = vmul.f32 0.25, %v2209_v42  ;;  %v5529_v36 = vmul.f32 0.25, %v2210_v38 }
 0x2a5   :  { %v5531_v13 = vmul.f32 0.25, %v2211_v8  ;;  %v5533_v12 = vmul.f32 0.25, %v2212_v29  ;;  %v5535_v48 = vmul.f32 0.25, %v2213_v26  ;;  %v5537_v1 = vmul.f32 0.25, %v2214_v18 }
 0x2a6   :  { %v5539_v45 = vmul.f32 0.25, %v2215_v34  ;;  %v5541_v53 = vmul.f32 0.25, %v2216_v47  ;;  %v5543_v25 = vmul.f32 0.25, %v2217_v61  ;;  %v5545_v50 = vmul.f32 0.25, %v2218_v4 }
 0x2a7   :  { %v5547_v31 = vmul.f32 0.25, %v2219_v7  ;;  %v5549_v2 = vmul.f32 0.25, %v2220_v28  ;;  %v5551_v43 = vmul.f32 0.25, %v2221_v22  ;;  %v5553_v46 = vmul.f32 0.25, %v2222_v40 }
 0x2a8   :  { %v5555_v19 = vmul.f32 0.25, %v2223_v10  ;;  %v5557_v30 = vmul.f32 0.25, %v2224_v6  ;;  %v5559_v51 = vmul.f32 0.25, %v2226_v52  ;;  %v2263_v41 = vmax.f32 %v2227_v3, 0.0 }
 0x2a9   :  { %v2264_v42 = vmax.f32 %v2228_v54, 0.0  ;;  %v2265_v38 = vmax.f32 %v2229_v16, 0.0  ;;  %v2266_v8 = vmax.f32 %v2230_v56, 0.0  ;;  %v2267_v29 = vmax.f32 %v2231_v57, 0.0 }
 0x2aa   :  { %v2268_v26 = vmax.f32 %v2232_v62, 0.0  ;;  %v2269_v18 = vmax.f32 %v2233_v5, 0.0  ;;  %v2270_v60 = vmax.f32 %v2234_v11, 0.0  ;;  %v2271_v34 = vmax.f32 %v2235_v44, 0.0  ;;  %2299 = vst [vmem:[#allocation2] sm:$0xff] %v2263_v41 }
 0x2ab   :  { %v2272_v14 = vmax.f32 %v2236_v32, 0.0  ;;  %2300 = vst [vmem:[#allocation2 + $0x8] sm:$0xff] %v2264_v42  ;;  %v2273_v47 = vmax.f32 %v2237_v15, 0.0  ;;  %v2274_v35 = vmax.f32 %v2238_v58, 0.0  ;;  %v2275_v61 = vmax.f32 %v2239_v27, 0.0  ;;  %2301 = vst [vmem:[#allocation2 + $0x10] sm:$0xff] %v2265_v38 }
 0x2ac   :  { %v2276_v9 = vmax.f32 %v2240_v33, 0.0  ;;  %2302 = vst [vmem:[#allocation2 + $0x18] sm:$0xff] %v2266_v8  ;;  %2303 = vst [vmem:[#allocation2 + $0x20] sm:$0xff] %v2267_v29  ;;  %v2277_v4 = vmax.f32 %v5519_v37, 0.0  ;;  %v2278_v59 = vmax.f32 %v5521_v17, 0.0  ;;  %v2279_v7 = vmax.f32 %v5523_v49, 0.0 }
 0x2ad   :  { %2304 = vst [vmem:[#allocation2 + $0x28] sm:$0xff] %v2268_v26  ;;  %v2280_v63 = vmax.f32 %v5525_v24, 0.0  ;;  %2305 = vst [vmem:[#allocation2 + $0x30] sm:$0xff] %v2269_v18  ;;  %v2281_v28 = vmax.f32 %v5527_v0, 0.0  ;;  %v2282_v55 = vmax.f32 %v5529_v36, 0.0  ;;  %v2283_v22 = vmax.f32 %v5531_v13, 0.0 }
 0x2ae   :  { %2306 = vst [vmem:[#allocation2 + $0x38] sm:$0xff] %v2270_v60  ;;  %2307 = vst [vmem:[#allocation2 + $0x40] sm:$0xff] %v2271_v34  ;;  %v2284_v21 = vmax.f32 %v5533_v12, 0.0  ;;  %v2285_v40 = vmax.f32 %v5535_v48, 0.0  ;;  %v2286_v20 = vmax.f32 %v5537_v1, 0.0  ;;  %v2287_v10 = vmax.f32 %v5539_v45, 0.0 }
 0x2af   :  { %2308 = vst [vmem:[#allocation2 + $0x48] sm:$0xff] %v2272_v14  ;;  %2309 = vst [vmem:[#allocation2 + $0x50] sm:$0xff] %v2273_v47  ;;  %v2288_v23 = vmax.f32 %v5541_v53, 0.0  ;;  %v2289_v6 = vmax.f32 %v5543_v25, 0.0  ;;  %v2290_v39 = vmax.f32 %v5545_v50, 0.0  ;;  %v2291_v52 = vmax.f32 %v5547_v31, 0.0 }
 0x2b0   :  { %2310 = vst [vmem:[#allocation2 + $0x58] sm:$0xff] %v2274_v35  ;;  %2311 = vst [vmem:[#allocation2 + $0x60] sm:$0xff] %v2275_v61  ;;  %v2292_v3 = vmax.f32 %v5549_v2, 0.0  ;;  %v2293_v54 = vmax.f32 %v5551_v43, 0.0  ;;  %v2294_v16 = vmax.f32 %v5553_v46, 0.0  ;;  %v2295_v56 = vmax.f32 %v5555_v19, 0.0 }
 0x2b1   :  { %2312 = vst [vmem:[#allocation2 + $0x68] sm:$0xff] %v2276_v9  ;;  %2313 = vst [vmem:[#allocation2 + $0x70] sm:$0xff] %v2277_v4  ;;  %v2296_v57 = vmax.f32 %v5557_v30, 0.0  ;;  %v2298_v62 = vmax.f32 %v5559_v51, 0.0 }
 0x2b2   :  { %2314 = vst [vmem:[#allocation2 + $0x78] sm:$0xff] %v2278_v59  ;;  %2315 = vst [vmem:[#allocation2 + $0x80] sm:$0xff] %v2279_v7 }
 0x2b3   :  { %2316 = vst [vmem:[#allocation2 + $0x88] sm:$0xff] %v2280_v63  ;;  %2317 = vst [vmem:[#allocation2 + $0x90] sm:$0xff] %v2281_v28 }
 0x2b4   :  { %2318 = vst [vmem:[#allocation2 + $0x98] sm:$0xff] %v2282_v55  ;;  %2319 = vst [vmem:[#allocation2 + $0xa0] sm:$0xff] %v2283_v22 }
 0x2b5   :  { %2320 = vst [vmem:[#allocation2 + $0xa8] sm:$0xff] %v2284_v21  ;;  %2321 = vst [vmem:[#allocation2 + $0xb0] sm:$0xff] %v2285_v40 }
 0x2b6   :  { %2322 = vst [vmem:[#allocation2 + $0xb8] sm:$0xff] %v2286_v20  ;;  %2323 = vst [vmem:[#allocation2 + $0xc0] sm:$0xff] %v2287_v10 }
 0x2b7   :  { %2324 = vst [vmem:[#allocation2 + $0xc8] sm:$0xff] %v2288_v23  ;;  %2325 = vst [vmem:[#allocation2 + $0xd0] sm:$0xff] %v2289_v6 }
 0x2b8   :  { %2326 = vst [vmem:[#allocation2 + $0xd8] sm:$0xff] %v2290_v39  ;;  %2327 = vst [vmem:[#allocation2 + $0xe0] sm:$0xff] %v2291_v52 }
 0x2b9   :  { %2328 = vst [vmem:[#allocation2 + $0xe8] sm:$0xff] %v2292_v3  ;;  %2329 = vst [vmem:[#allocation2 + $0xf0] sm:$0xff] %v2293_v54 }
 0x2ba   :  { %2330 = vst [vmem:[#allocation2 + $0xf8] sm:$0xff] %v2294_v16  ;;  %2331 = vst [vmem:[#allocation2 + $0x100] sm:$0xff] %v2295_v56 }
 0x2bb   :  { %2332 = vst [vmem:[#allocation2 + $0x108] sm:$0xff] %v2296_v57  ;;  %2334 = vst [vmem:[#allocation2 + $0x118] sm:$0xff] %v2298_v62 }
 0x2bc   :  { %2892 = shalt.err (!%p2889_p4)
}
 0x2bd   :  { %s2904_s17 = smov 128   ;;  %s2905_s18 = smov 8  }
 0x2be   :  { %2346 = dma.vmem_to_hbm [thread:$0]  %s2341_s15, 4608, %s5587_s2, [#allocation3], %s2904_s17, %s2904_s17, %s2905_s18  }
 0x2bf   :  { %2901 = dma.done.wait [#allocation3], 4608  }
 0x2c0   :  { %2902 = vsyncadd [#allocation3], 4294962688 }
 0x2c1   :  { %2350 = vsyncpa [#allocation3], 1 }

</bundles_post_ra>
